<compile_context>
chip_gen: v7x
topology: tpu7x:2x2x1
jax: 0.10.0
libtpu: 0.0.40
codegen_flags: <defaults>
</compile_context>

<pallas_src>
import jax
import jax.numpy as jnp
from jax import lax
from jax.experimental import pallas as pl
from jax.experimental.pallas import tpu as pltpu
import numpy as np

PAD_token = 1


def _round_up(x, m):
    return ((x + m - 1) // m) * m


# ----------------------------------------------------------------------------
# Pass 1: hoisted input projection  gx = x @ [W_if | W_ib] + [b_f | b_b]
# ----------------------------------------------------------------------------
def input_proj_kernel(x_ref, wi_ref, bi_ref, gxf_ref, gxb_ref):
    G = gxf_ref.shape[-1]                      # 3 * Hp
    gx = jnp.dot(x_ref[...], wi_ref[...],
                 preferred_element_type=jnp.float32) + bi_ref[...]
    gxf_ref[...] = gx[:, :G]                   # lane-aligned split (G % 128 == 0)
    gxb_ref[...] = gx[:, G:]


def input_projection(emb_2d, wi_cat, bi_cat, *, rows_blk):
    R, Hp = emb_2d.shape
    G = wi_cat.shape[1] // 2
    nt = R // rows_blk
    return pl.pallas_call(
        input_proj_kernel,
        out_shape=(jax.ShapeDtypeStruct((R, G), jnp.float32),
                   jax.ShapeDtypeStruct((R, G), jnp.float32)),
        grid=(nt,),
        in_specs=[pl.BlockSpec((rows_blk, Hp), lambda i: (i, 0)),
                  pl.BlockSpec((Hp, 2 * G), lambda i: (0, 0)),
                  pl.BlockSpec((1, 2 * G), lambda i: (0, 0))],
        out_specs=(pl.BlockSpec((rows_blk, G), lambda i: (i, 0)),
                   pl.BlockSpec((rows_blk, G), lambda i: (i, 0))),
        compiler_params=pltpu.CompilerParams(
            dimension_semantics=("parallel",)),
    )(emb_2d, wi_cat, bi_cat)


# ----------------------------------------------------------------------------
# Pass 2: fused bidirectional GRU recurrence over a grid of time blocks
# ----------------------------------------------------------------------------
def bigru_recurrence_kernel(lens_ref, gxf_ref, gxb_ref,
                            whf_ref, bhnf_ref, whb_ref, bhnb_ref,
                            outf_ref, outb_ref, hidf_ref, hidb_ref,
                            hf_s, hb_s):
    bt, _, G = gxf_ref.shape
    Hp = G // 3
    i = pl.program_id(0)
    nt = pl.num_programs(0)

    @pl.when(i == 0)
    def _init():
        hf_s[...] = jnp.zeros_like(hf_s)
        hb_s[...] = jnp.zeros_like(hb_s)

    lens = lens_ref[...]                       # (Bp, 1) int32, hoisted
    whf = whf_ref[...]
    whb = whb_ref[...]
    bhnf = bhnf_ref[...]
    bhnb = bhnb_ref[...]
    base_f = i * bt                            # first global t of the fwd block
    base_b = (nt - 1 - i) * bt                 # first global t of the bwd block

    def gru_step(gx, h, wh, bhn):
        # gx already contains x@W_i + b_i (+ b_h for r,z gates).
        gh = jnp.dot(h, wh, preferred_element_type=jnp.float32)
        r = jax.nn.sigmoid(gx[:, :Hp] + gh[:, :Hp])
        z = jax.nn.sigmoid(gx[:, Hp:2 * Hp] + gh[:, Hp:2 * Hp])
        n = jnp.tanh(gx[:, 2 * Hp:] + r * (gh[:, 2 * Hp:] + bhn))
        return (1.0 - z) * n + z * h

    def body(j, carry):
        hf, hb = carry
        # ---- forward direction: global time base_f + j ----
        hf_new = gru_step(gxf_ref[j], hf, whf, bhnf)
        vf = (base_f + j) < lens                                 # (Bp, 1) bool
        outf_ref[j] = jnp.where(vf, hf_new, 0.0)
        hf = jnp.where(vf, hf_new, hf)
        # ---- backward direction: global time base_b + (bt - 1 - j) ----
        jb = bt - 1 - j
        hb_new = gru_step(gxb_ref[jb], hb, whb, bhnb)
        vb = (base_b + jb) < lens
        outb_ref[jb] = jnp.where(vb, hb_new, 0.0)
        hb = jnp.where(vb, hb_new, hb)
        return (hf, hb)

    hf, hb = lax.fori_loop(0, bt, body, (hf_s[...], hb_s[...]), unroll=True)
    hf_s[...] = hf
    hb_s[...] = hb
    # Resident output blocks: only the last grid step's values are written back.
    hidf_ref[...] = hf
    hidb_ref[...] = hb


def bigru_recurrence(lens2d, gxf, gxb, whf, bhnf, whb, bhnb, *, block_t):
    Tp, Bp, G = gxf.shape
    Hp = G // 3
    nt = Tp // block_t
    out_shape = (
        jax.ShapeDtypeStruct((Tp, Bp, Hp), jnp.float32),   # fwd outputs
        jax.ShapeDtypeStruct((Tp, Bp, Hp), jnp.float32),   # bwd outputs
        jax.ShapeDtypeStruct((Bp, Hp), jnp.float32),       # fwd final hidden
        jax.ShapeDtypeStruct((Bp, Hp), jnp.float32),       # bwd final hidden
    )
    return pl.pallas_call(
        bigru_recurrence_kernel,
        out_shape=out_shape,
        grid=(nt,),
        in_specs=[
            pl.BlockSpec((Bp, 1), lambda i: (0, 0)),                       # lens
            pl.BlockSpec((block_t, Bp, G), lambda i: (i, 0, 0)),           # gx fwd
            pl.BlockSpec((block_t, Bp, G), lambda i: (nt - 1 - i, 0, 0)),  # gx bwd
            pl.BlockSpec((Hp, G), lambda i: (0, 0)),                       # W_hf
            pl.BlockSpec((1, Hp), lambda i: (0, 0)),                       # b_hn fwd
            pl.BlockSpec((Hp, G), lambda i: (0, 0)),                       # W_hb
            pl.BlockSpec((1, Hp), lambda i: (0, 0)),                       # b_hn bwd
        ],
        out_specs=(
            pl.BlockSpec((block_t, Bp, Hp), lambda i: (i, 0, 0)),
            pl.BlockSpec((block_t, Bp, Hp), lambda i: (nt - 1 - i, 0, 0)),
            pl.BlockSpec((Bp, Hp), lambda i: (0, 0)),
            pl.BlockSpec((Bp, Hp), lambda i: (0, 0)),
        ),
        scratch_shapes=[pltpu.VMEM((Bp, Hp), jnp.float32),
                        pltpu.VMEM((Bp, Hp), jnp.float32)],
        compiler_params=pltpu.CompilerParams(
            dimension_semantics=("arbitrary",)),
    )(lens2d, gxf, gxb, whf, bhnf, whb, bhnb)


# ----------------------------------------------------------------------------
# Parameter preparation: lane-pad hidden/gates, fold biases, concat directions
# ----------------------------------------------------------------------------
def _pad_gate_cols(a, H, Hp):
    """(..., 3H) -> (..., 3Hp): zero-pad each gate block [r | z | n]."""
    pad = [(0, 0)] * (a.ndim - 1) + [(0, Hp - H)]
    return jnp.concatenate(
        [jnp.pad(a[..., g * H:(g + 1) * H], pad) for g in range(3)], axis=-1)


def prepare_kernel_params(params, Hp):
    H = params["emb"].shape[1]

    def pad_w(w):                              # (H, 3H) -> (Hp, 3Hp)
        return jnp.pad(_pad_gate_cols(w, H, Hp), ((0, Hp - H), (0, 0)))

    def fold_bias(bi, bh):                     # bi + [bh_r, bh_z, 0], padded
        fold = jnp.concatenate(
            [bi[:, :2 * H] + bh[:, :2 * H], bi[:, 2 * H:]], axis=1)
        return _pad_gate_cols(fold, H, Hp)

    wi_cat = jnp.concatenate([pad_w(params["wif"]), pad_w(params["wib"])],
                             axis=1)                        # (Hp, 6Hp)
    bi_cat = jnp.concatenate([fold_bias(params["bif"], params["bhf"]),
                              fold_bias(params["bib"], params["bhb"])],
                             axis=1)                        # (1, 6Hp)
    whf = pad_w(params["whf"])
    whb = pad_w(params["whb"])
    bhnf = jnp.pad(params["bhf"][:, 2 * H:], ((0, 0), (0, Hp - H)))
    bhnb = jnp.pad(params["bhb"][:, 2 * H:], ((0, 0), (0, Hp - H)))
    emb_p = jnp.pad(params["emb"], ((0, 0), (0, Hp - H)))
    return emb_p, wi_cat, bi_cat, whf, bhnf, whb, bhnb


# ----------------------------------------------------------------------------
# EncoderRNN forward (wrapper glue: embedding gather, padding, transposes)
# ----------------------------------------------------------------------------
def encoder_rnn_forward(params, input_seqs, input_lengths, block_t=4):
    """input_seqs: (B, T) int32, input_lengths: (B,) int32 (sorted desc).
    Returns (outputs (B, T, H), hidden (1, B, H))."""
    B, T = input_seqs.shape
    H = params["emb"].shape[1]
    Hp = _round_up(H, 128)                     # lane-align hidden / gate slices
    Bp = _round_up(B, 8)                       # sublane-align batch
    Tp = _round_up(T, block_t)

    emb_p, wi_cat, bi_cat, whf, bhnf, whb, bhnb = prepare_kernel_params(params, Hp)

    # Embedding lookup directly in time-major layout (no (B,T,H) round trip).
    tokens_tm = jnp.pad(jnp.transpose(input_seqs, (1, 0)),
                        ((0, Tp - T), (0, Bp - B)), constant_values=PAD_token)
    emb_tm = jnp.take(emb_p, tokens_tm, axis=0)            # (Tp, Bp, Hp)
    # TODO(synk): dropout_layer is identity here (eval mode); training dropout
    # would use pltpu.prng_random_bits inside the projection kernel.

    lens2d = jnp.pad(input_lengths.astype(jnp.int32),
                     (0, Bp - B)).reshape(Bp, 1)           # padded rows: len 0

    # Pass 1: one big batched MXU matmul for both directions' input projections.
    gxf_2d, gxb_2d = input_projection(emb_tm.reshape(Tp * Bp, Hp),
                                      wi_cat, bi_cat, rows_blk=block_t * Bp)
    gxf = gxf_2d.reshape(Tp, Bp, 3 * Hp)
    gxb = gxb_2d.reshape(Tp, Bp, 3 * Hp)

    # Pass 2: fused fwd+bwd recurrence streamed over time blocks.
    out_f, out_b, hid_f, hid_b = bigru_recurrence(
        lens2d, gxf, gxb, whf, bhnf, whb, bhnb, block_t=block_t)

    outputs = jnp.transpose((out_f + out_b)[:T, :B, :H], (1, 0, 2))
    hidden = (hid_f + hid_b)[:B, :H][None]
    return outputs, hidden


# ----------------------------------------------------------------------------
# Pure-JAX reference (same math, unpadded) for correctness checking
# ----------------------------------------------------------------------------
def encoder_rnn_reference(params, input_seqs, input_lengths):
    emb = params["emb"][input_seqs].astype(jnp.float32)
    B, T, H = emb.shape
    lens = input_lengths

    def cell(x, h, wi, wh, bi, bh):
        gx = x @ wi + bi
        gh = h @ wh + bh
        r = jax.nn.sigmoid(gx[:, :H] + gh[:, :H])
        z = jax.nn.sigmoid(gx[:, H:2 * H] + gh[:, H:2 * H])
        n = jnp.tanh(gx[:, 2 * H:] + r * gh[:, 2 * H:])
        return (1.0 - z) * n + z * h

    hf = jnp.zeros((B, H), jnp.float32)
    out_f = []
    for t in range(T):
        hn = cell(emb[:, t], hf, params["wif"], params["whf"],
                  params["bif"], params["bhf"])
        valid = (t < lens)[:, None].astype(jnp.float32)
        out_f.append(valid * hn)
        hf = valid * hn + (1.0 - valid) * hf

    hb = jnp.zeros((B, H), jnp.float32)
    out_b = [None] * T
    for t in reversed(range(T)):
        hn = cell(emb[:, t], hb, params["wib"], params["whb"],
                  params["bib"], params["bhb"])
        valid = (t < lens)[:, None].astype(jnp.float32)
        out_b[t] = valid * hn
        hb = valid * hn + (1.0 - valid) * hb

    outputs = jnp.stack(out_f, 1) + jnp.stack(out_b, 1)
    hidden = (hf + hb)[None]
    return outputs, hidden


# ----------------------------------------------------------------------------
# Deterministic parameter init (shapes implied by __init__)
# ----------------------------------------------------------------------------
def init_params(key, vocab_size, hidden_size):
    H = hidden_size
    ks = jax.random.split(key, 9)
    bound = 1.0 / np.sqrt(H)
    u = lambda k, shape: jax.random.uniform(k, shape, jnp.float32, -bound, bound)
    emb = 0.1 * jax.random.normal(ks[0], (vocab_size, H), jnp.float32)
    return {
        "emb": emb,                       # nn.Embedding(vocab, H), normal(0, 0.1)
        # forward direction (weight_ih_l0^T, weight_hh_l0^T, biases), gates [r,z,n]
        "wif": u(ks[1], (H, 3 * H)), "whf": u(ks[2], (H, 3 * H)),
        "bif": u(ks[3], (1, 3 * H)), "bhf": u(ks[4], (1, 3 * H)),
        # reverse direction
        "wib": u(ks[5], (H, 3 * H)), "whb": u(ks[6], (H, 3 * H)),
        "bib": u(ks[7], (1, 3 * H)), "bhb": u(ks[8], (1, 3 * H)),
    }


if __name__ == "__main__":
    key = jax.random.PRNGKey(0)
    vocab_size, hidden_size = 50, 32
    B, T = 4, 8

    kp, ks = jax.random.split(key)
    params = init_params(kp, vocab_size, hidden_size)

    input_seqs = jax.random.randint(ks, (B, T), 0, vocab_size, dtype=jnp.int32)
    input_lengths = jnp.array([8, 7, 5, 3], dtype=jnp.int32)  # sorted desc
    # zero out padded token positions (as a padded batch would look)
    pos = jnp.arange(T)[None, :]
    input_seqs = jnp.where(pos < input_lengths[:, None], input_seqs, PAD_token)

    outputs, hidden = jax.jit(encoder_rnn_forward)(params, input_seqs,
                                                   input_lengths)
    jax.block_until_ready((outputs, hidden))

    ref_out, ref_hid = encoder_rnn_reference(params, input_seqs, input_lengths)
    assert outputs.shape == (B, T, hidden_size)
    assert hidden.shape == (1, B, hidden_size)
    np.testing.assert_allclose(np.asarray(outputs), np.asarray(ref_out),
                               rtol=1e-4, atol=1e-4)
    np.testing.assert_allclose(np.asarray(hidden), np.asarray(ref_hid),
                               rtol=1e-4, atol=1e-4)
    print("KERNEL_OK")
</pallas_src>

<mosaic_0001>
module attributes {stable_mosaic.version = 11 : i64} {
  func.func @input_proj_kernel(%arg0: i32, %arg1: memref<32x128xf32, #tpu.memory_space<vmem>>, %arg2: memref<128x768xf32, #tpu.memory_space<vmem>>, %arg3: memref<1x768xf32, #tpu.memory_space<vmem>>, %arg4: memref<32x384xf32, #tpu.memory_space<vmem>>, %arg5: memref<32x384xf32, #tpu.memory_space<vmem>>) attributes {dimension_semantics = [#tpu.dimension_semantics<parallel>], iteration_bounds = array<i64: 2>, scalar_prefetch = 0 : i64, scratch_operands = 0 : i64, tpu.core_type = #tpu.core_type<tc>, window_params = [{transform_indices = @transform_0, window_bounds = array<i64: 32, 128>}, {pipeline_mode = #tpu.pipeline_mode<synchronous>, transform_indices = @transform_1, window_bounds = array<i64: 128, 768>}, {pipeline_mode = #tpu.pipeline_mode<synchronous>, transform_indices = @transform_2, window_bounds = array<i64: 1, 768>}, {transform_indices = @transform_3, window_bounds = array<i64: 32, 384>}, {transform_indices = @transform_4, window_bounds = array<i64: 32, 384>}]} {
    %c0 = arith.constant 0 : index
    %c0_0 = arith.constant 0 : index
    %0 = vector.load %arg1[%c0, %c0_0] : memref<32x128xf32, #tpu.memory_space<vmem>>, vector<32x128xf32>
    %c0_1 = arith.constant 0 : index
    %c0_2 = arith.constant 0 : index
    %1 = vector.load %arg2[%c0_1, %c0_2] : memref<128x768xf32, #tpu.memory_space<vmem>>, vector<128x768xf32>
    %cst = arith.constant dense<0.000000e+00> : vector<32x768xf32>
    %2 = tpu.matmul %0, %1, %cst {dimension_numbers = #tpu.dot_dimension_numbers<[1], [0], [0], [1], [0, 0, 1, 1], [], []>} : vector<32x128xf32>, vector<128x768xf32>, vector<32x768xf32> -> vector<32x768xf32>
    %c0_3 = arith.constant 0 : index
    %c0_4 = arith.constant 0 : index
    %3 = vector.load %arg3[%c0_3, %c0_4] : memref<1x768xf32, #tpu.memory_space<vmem>>, vector<1x768xf32>
    %4 = vector.broadcast %3 : vector<1x768xf32> to vector<32x768xf32>
    %5 = arith.addf %2, %4 : vector<32x768xf32>
    %6 = vector.extract_strided_slice %5 {offsets = [0, 0], sizes = [32, 384], strides = [1, 1]} : vector<32x768xf32> to vector<32x384xf32>
    %c0_5 = arith.constant 0 : index
    %c0_6 = arith.constant 0 : index
    %7 = vector.load %arg4[%c0_5, %c0_6] : memref<32x384xf32, #tpu.memory_space<vmem>>, vector<32x384xf32>
    tpu.vector_store %arg4[%c0_5, %c0_6], %6 {strides = array<i32>} : memref<32x384xf32, #tpu.memory_space<vmem>>, vector<32x384xf32>,
    %8 = vector.extract_strided_slice %5 {offsets = [0, 384], sizes = [32, 384], strides = [1, 1]} : vector<32x768xf32> to vector<32x384xf32>
    %c0_7 = arith.constant 0 : index
    %c0_8 = arith.constant 0 : index
    %9 = vector.load %arg5[%c0_7, %c0_8] : memref<32x384xf32, #tpu.memory_space<vmem>>, vector<32x384xf32>
    tpu.vector_store %arg5[%c0_7, %c0_8], %8 {strides = array<i32>} : memref<32x384xf32, #tpu.memory_space<vmem>>, vector<32x384xf32>,
    return
  }
  func.func @transform_0(%arg0: i32) -> (i32, i32) {
    %c0_i32 = arith.constant 0 : i32
    %c0_i32_0 = arith.constant 0 : i32
    return %arg0, %c0_i32 : i32, i32
  }
  func.func @transform_1(%arg0: i32) -> (i32, i32) {
    %c0_i32 = arith.constant 0 : i32
    %c0_i32_0 = arith.constant 0 : i32
    %c0_i32_1 = arith.constant 0 : i32
    return %c0_i32, %c0_i32_0 : i32, i32
  }
  func.func @transform_2(%arg0: i32) -> (i32, i32) {
    %c0_i32 = arith.constant 0 : i32
    %c0_i32_0 = arith.constant 0 : i32
    %c0_i32_1 = arith.constant 0 : i32
    return %c0_i32, %c0_i32_0 : i32, i32
  }
  func.func @transform_3(%arg0: i32) -> (i32, i32) {
    %c0_i32 = arith.constant 0 : i32
    %c0_i32_0 = arith.constant 0 : i32
    return %arg0, %c0_i32 : i32, i32
  }
  func.func @transform_4(%arg0: i32) -> (i32, i32) {
    %c0_i32 = arith.constant 0 : i32
    %c0_i32_0 = arith.constant 0 : i32
    return %arg0, %c0_i32 : i32, i32
  }
}

module attributes {stable_mosaic.version = 11 : i64} {
  func.func @bigru_recurrence_kernel(%arg0: i32, %arg1: memref<8x1xi32, #tpu.memory_space<vmem>>, %arg2: memref<4x8x384xf32, #tpu.memory_space<vmem>>, %arg3: memref<4x8x384xf32, #tpu.memory_space<vmem>>, %arg4: memref<128x384xf32, #tpu.memory_space<vmem>>, %arg5: memref<1x128xf32, #tpu.memory_space<vmem>>, %arg6: memref<128x384xf32, #tpu.memory_space<vmem>>, %arg7: memref<1x128xf32, #tpu.memory_space<vmem>>, %arg8: memref<4x8x128xf32, #tpu.memory_space<vmem>>, %arg9: memref<4x8x128xf32, #tpu.memory_space<vmem>>, %arg10: memref<8x128xf32, #tpu.memory_space<vmem>>, %arg11: memref<8x128xf32, #tpu.memory_space<vmem>>, %arg12: memref<8x128xf32, #tpu.memory_space<vmem>>, %arg13: memref<8x128xf32, #tpu.memory_space<vmem>>) attributes {dimension_semantics = [#tpu.dimension_semantics<arbitrary>], iteration_bounds = array<i64: 2>, scalar_prefetch = 0 : i64, scratch_operands = 2 : i64, tpu.core_type = #tpu.core_type<tc>, window_params = [{pipeline_mode = #tpu.pipeline_mode<synchronous>, transform_indices = @transform_0, window_bounds = array<i64: 8, 1>}, {transform_indices = @transform_1, window_bounds = array<i64: 4, 8, 384>}, {transform_indices = @transform_2, window_bounds = array<i64: 4, 8, 384>}, {pipeline_mode = #tpu.pipeline_mode<synchronous>, transform_indices = @transform_3, window_bounds = array<i64: 128, 384>}, {pipeline_mode = #tpu.pipeline_mode<synchronous>, transform_indices = @transform_4, window_bounds = array<i64: 1, 128>}, {pipeline_mode = #tpu.pipeline_mode<synchronous>, transform_indices = @transform_5, window_bounds = array<i64: 128, 384>}, {pipeline_mode = #tpu.pipeline_mode<synchronous>, transform_indices = @transform_6, window_bounds = array<i64: 1, 128>}, {transform_indices = @transform_7, window_bounds = array<i64: 4, 8, 128>}, {transform_indices = @transform_8, window_bounds = array<i64: 4, 8, 128>}, {pipeline_mode = #tpu.pipeline_mode<synchronous>, transform_indices = @transform_9, window_bounds = array<i64: 8, 128>}, {pipeline_mode = #tpu.pipeline_mode<synchronous>, transform_indices = @transform_10, window_bounds = array<i64: 8, 128>}]} {
    %c0_i32 = arith.constant 0 : i32
    %0 = arith.cmpi eq, %arg0, %c0_i32 : i32
    %1 = arith.extui %0 : i1 to i32
    %c0_i32_0 = arith.constant 0 : i32
    %2 = arith.cmpi ne, %1, %c0_i32_0 : i32
    scf.if %2 {
      %cst_101 = arith.constant 0.000000e+00 : f32
      %389 = vector.broadcast %cst_101 : f32 to vector<8x128xf32>
      %c0_102 = arith.constant 0 : index
      %c0_103 = arith.constant 0 : index
      %390 = vector.load %arg12[%c0_102, %c0_103] : memref<8x128xf32, #tpu.memory_space<vmem>>, vector<8x128xf32>
      tpu.vector_store %arg12[%c0_102, %c0_103], %389 {strides = array<i32>} : memref<8x128xf32, #tpu.memory_space<vmem>>, vector<8x128xf32>,
      %cst_104 = arith.constant 0.000000e+00 : f32
      %391 = vector.broadcast %cst_104 : f32 to vector<8x128xf32>
      %c0_105 = arith.constant 0 : index
      %c0_106 = arith.constant 0 : index
      %392 = vector.load %arg13[%c0_105, %c0_106] : memref<8x128xf32, #tpu.memory_space<vmem>>, vector<8x128xf32>
      tpu.vector_store %arg13[%c0_105, %c0_106], %391 {strides = array<i32>} : memref<8x128xf32, #tpu.memory_space<vmem>>, vector<8x128xf32>,
    } else {
    }
    %c0 = arith.constant 0 : index
    %c0_1 = arith.constant 0 : index
    %3 = vector.load %arg1[%c0, %c0_1] : memref<8x1xi32, #tpu.memory_space<vmem>>, vector<8x1xi32>
    %c0_2 = arith.constant 0 : index
    %c0_3 = arith.constant 0 : index
    %4 = vector.load %arg4[%c0_2, %c0_3] : memref<128x384xf32, #tpu.memory_space<vmem>>, vector<128x384xf32>
    %c0_4 = arith.constant 0 : index
    %c0_5 = arith.constant 0 : index
    %5 = vector.load %arg6[%c0_4, %c0_5] : memref<128x384xf32, #tpu.memory_space<vmem>>, vector<128x384xf32>
    %c0_6 = arith.constant 0 : index
    %c0_7 = arith.constant 0 : index
    %6 = vector.load %arg5[%c0_6, %c0_7] : memref<1x128xf32, #tpu.memory_space<vmem>>, vector<1x128xf32>
    %c0_8 = arith.constant 0 : index
    %c0_9 = arith.constant 0 : index
    %7 = vector.load %arg7[%c0_8, %c0_9] : memref<1x128xf32, #tpu.memory_space<vmem>>, vector<1x128xf32>
    %c4_i32 = arith.constant 4 : i32
    %8 = arith.muli %arg0, %c4_i32 : i32
    %c1_i32 = arith.constant 1 : i32
    %9 = arith.subi %c1_i32, %arg0 : i32
    %c4_i32_10 = arith.constant 4 : i32
    %10 = arith.muli %9, %c4_i32_10 : i32
    %c0_11 = arith.constant 0 : index
    %c0_12 = arith.constant 0 : index
    %11 = vector.load %arg12[%c0_11, %c0_12] : memref<8x128xf32, #tpu.memory_space<vmem>>, vector<8x128xf32>
    %c0_13 = arith.constant 0 : index
    %c0_14 = arith.constant 0 : index
    %12 = vector.load %arg13[%c0_13, %c0_14] : memref<8x128xf32, #tpu.memory_space<vmem>>, vector<8x128xf32>
    %c0_i32_15 = arith.constant 0 : i32
    %13 = arith.index_cast %c0_i32_15 : i32 to index
    %c0_16 = arith.constant 0 : index
    %c0_17 = arith.constant 0 : index
    %14 = vector.load %arg2[%13, %c0_16, %c0_17] : memref<4x8x384xf32, #tpu.memory_space<vmem>>, vector<1x8x384xf32>
    %15 = vector.shape_cast %14 : vector<1x8x384xf32> to vector<8x384xf32>
    %cst = arith.constant dense<0.000000e+00> : vector<8x384xf32>
    %16 = tpu.matmul %11, %4, %cst {dimension_numbers = #tpu.dot_dimension_numbers<[1], [0], [0], [1], [0, 0, 1, 1], [], []>} : vector<8x128xf32>, vector<128x384xf32>, vector<8x384xf32> -> vector<8x384xf32>
    %17 = vector.extract_strided_slice %15 {offsets = [0, 0], sizes = [8, 128], strides = [1, 1]} : vector<8x384xf32> to vector<8x128xf32>
    %18 = vector.extract_strided_slice %16 {offsets = [0, 0], sizes = [8, 128], strides = [1, 1]} : vector<8x384xf32> to vector<8x128xf32>
    %19 = arith.addf %17, %18 : vector<8x128xf32>
    %20 = arith.negf %19 : vector<8x128xf32>
    %21 = math.exp %20 : vector<8x128xf32>
    %cst_18 = arith.constant 1.000000e+00 : f32
    %22 = vector.broadcast %cst_18 : f32 to vector<8x128xf32>
    %23 = arith.addf %22, %21 : vector<8x128xf32>
    %24 = arith.divf %22, %23 : vector<8x128xf32>
    %25 = vector.extract_strided_slice %15 {offsets = [0, 128], sizes = [8, 128], strides = [1, 1]} : vector<8x384xf32> to vector<8x128xf32>
    %26 = vector.extract_strided_slice %16 {offsets = [0, 128], sizes = [8, 128], strides = [1, 1]} : vector<8x384xf32> to vector<8x128xf32>
    %27 = arith.addf %25, %26 : vector<8x128xf32>
    %28 = arith.negf %27 : vector<8x128xf32>
    %29 = math.exp %28 : vector<8x128xf32>
    %cst_19 = arith.constant 1.000000e+00 : f32
    %30 = vector.broadcast %cst_19 : f32 to vector<8x128xf32>
    %31 = arith.addf %30, %29 : vector<8x128xf32>
    %32 = arith.divf %30, %31 : vector<8x128xf32>
    %33 = vector.extract_strided_slice %15 {offsets = [0, 256], sizes = [8, 128], strides = [1, 1]} : vector<8x384xf32> to vector<8x128xf32>
    %34 = vector.extract_strided_slice %16 {offsets = [0, 256], sizes = [8, 128], strides = [1, 1]} : vector<8x384xf32> to vector<8x128xf32>
    %35 = vector.broadcast %6 : vector<1x128xf32> to vector<8x128xf32>
    %36 = arith.addf %34, %35 : vector<8x128xf32>
    %37 = arith.mulf %24, %36 : vector<8x128xf32>
    %38 = arith.addf %33, %37 : vector<8x128xf32>
    %39 = math.tanh %38 : vector<8x128xf32>
    %cst_20 = arith.constant 1.000000e+00 : f32
    %40 = vector.broadcast %cst_20 : f32 to vector<8x128xf32>
    %41 = arith.subf %40, %32 : vector<8x128xf32>
    %42 = arith.mulf %41, %39 : vector<8x128xf32>
    %43 = arith.mulf %32, %11 : vector<8x128xf32>
    %44 = arith.addf %42, %43 : vector<8x128xf32>
    %45 = arith.addi %8, %c0_i32_15 : i32
    %46 = vector.broadcast %45 : i32 to vector<8x1xi32>
    %47 = arith.cmpi slt, %46, %3 : vector<8x1xi32>
    %cst_21 = arith.constant 0.000000e+00 : f32
    %48 = vector.shape_cast %47 : vector<8x1xi1> to vector<8x1xi1>
    %49 = vector.broadcast %48 : vector<8x1xi1> to vector<8x128xi1>
    %50 = vector.broadcast %cst_21 : f32 to vector<8x128xf32>
    %51 = arith.select %49, %44, %50 : vector<8x128xi1>, vector<8x128xf32>
    %52 = arith.index_cast %c0_i32_15 : i32 to index
    %c0_22 = arith.constant 0 : index
    %c0_23 = arith.constant 0 : index
    %53 = vector.load %arg8[%52, %c0_22, %c0_23] : memref<4x8x128xf32, #tpu.memory_space<vmem>>, vector<1x8x128xf32>
    %54 = vector.shape_cast %53 : vector<1x8x128xf32> to vector<8x128xf32>
    %55 = vector.shape_cast %51 : vector<8x128xf32> to vector<1x8x128xf32>
    tpu.vector_store %arg8[%52, %c0_22, %c0_23], %55 {strides = array<i32>} : memref<4x8x128xf32, #tpu.memory_space<vmem>>, vector<1x8x128xf32>,
    %56 = vector.shape_cast %47 : vector<8x1xi1> to vector<8x1xi1>
    %57 = vector.broadcast %56 : vector<8x1xi1> to vector<8x128xi1>
    %58 = arith.select %57, %44, %11 : vector<8x128xi1>, vector<8x128xf32>
    %c3_i32 = arith.constant 3 : i32
    %59 = arith.subi %c3_i32, %c0_i32_15 : i32
    %60 = arith.index_cast %59 : i32 to index
    %c0_24 = arith.constant 0 : index
    %c0_25 = arith.constant 0 : index
    %61 = vector.load %arg3[%60, %c0_24, %c0_25] : memref<4x8x384xf32, #tpu.memory_space<vmem>>, vector<1x8x384xf32>
    %62 = vector.shape_cast %61 : vector<1x8x384xf32> to vector<8x384xf32>
    %cst_26 = arith.constant dense<0.000000e+00> : vector<8x384xf32>
    %63 = tpu.matmul %12, %5, %cst_26 {dimension_numbers = #tpu.dot_dimension_numbers<[1], [0], [0], [1], [0, 0, 1, 1], [], []>} : vector<8x128xf32>, vector<128x384xf32>, vector<8x384xf32> -> vector<8x384xf32>
    %64 = vector.extract_strided_slice %62 {offsets = [0, 0], sizes = [8, 128], strides = [1, 1]} : vector<8x384xf32> to vector<8x128xf32>
    %65 = vector.extract_strided_slice %63 {offsets = [0, 0], sizes = [8, 128], strides = [1, 1]} : vector<8x384xf32> to vector<8x128xf32>
    %66 = arith.addf %64, %65 : vector<8x128xf32>
    %67 = arith.negf %66 : vector<8x128xf32>
    %68 = math.exp %67 : vector<8x128xf32>
    %cst_27 = arith.constant 1.000000e+00 : f32
    %69 = vector.broadcast %cst_27 : f32 to vector<8x128xf32>
    %70 = arith.addf %69, %68 : vector<8x128xf32>
    %71 = arith.divf %69, %70 : vector<8x128xf32>
    %72 = vector.extract_strided_slice %62 {offsets = [0, 128], sizes = [8, 128], strides = [1, 1]} : vector<8x384xf32> to vector<8x128xf32>
    %73 = vector.extract_strided_slice %63 {offsets = [0, 128], sizes = [8, 128], strides = [1, 1]} : vector<8x384xf32> to vector<8x128xf32>
    %74 = arith.addf %72, %73 : vector<8x128xf32>
    %75 = arith.negf %74 : vector<8x128xf32>
    %76 = math.exp %75 : vector<8x128xf32>
    %cst_28 = arith.constant 1.000000e+00 : f32
    %77 = vector.broadcast %cst_28 : f32 to vector<8x128xf32>
    %78 = arith.addf %77, %76 : vector<8x128xf32>
    %79 = arith.divf %77, %78 : vector<8x128xf32>
    %80 = vector.extract_strided_slice %62 {offsets = [0, 256], sizes = [8, 128], strides = [1, 1]} : vector<8x384xf32> to vector<8x128xf32>
    %81 = vector.extract_strided_slice %63 {offsets = [0, 256], sizes = [8, 128], strides = [1, 1]} : vector<8x384xf32> to vector<8x128xf32>
    %82 = vector.broadcast %7 : vector<1x128xf32> to vector<8x128xf32>
    %83 = arith.addf %81, %82 : vector<8x128xf32>
    %84 = arith.mulf %71, %83 : vector<8x128xf32>
    %85 = arith.addf %80, %84 : vector<8x128xf32>
    %86 = math.tanh %85 : vector<8x128xf32>
    %cst_29 = arith.constant 1.000000e+00 : f32
    %87 = vector.broadcast %cst_29 : f32 to vector<8x128xf32>
    %88 = arith.subf %87, %79 : vector<8x128xf32>
    %89 = arith.mulf %88, %86 : vector<8x128xf32>
    %90 = arith.mulf %79, %12 : vector<8x128xf32>
    %91 = arith.addf %89, %90 : vector<8x128xf32>
    %92 = arith.addi %10, %59 : i32
    %93 = vector.broadcast %92 : i32 to vector<8x1xi32>
    %94 = arith.cmpi slt, %93, %3 : vector<8x1xi32>
    %cst_30 = arith.constant 0.000000e+00 : f32
    %95 = vector.shape_cast %94 : vector<8x1xi1> to vector<8x1xi1>
    %96 = vector.broadcast %95 : vector<8x1xi1> to vector<8x128xi1>
    %97 = vector.broadcast %cst_30 : f32 to vector<8x128xf32>
    %98 = arith.select %96, %91, %97 : vector<8x128xi1>, vector<8x128xf32>
    %99 = arith.index_cast %59 : i32 to index
    %c0_31 = arith.constant 0 : index
    %c0_32 = arith.constant 0 : index
    %100 = vector.load %arg9[%99, %c0_31, %c0_32] : memref<4x8x128xf32, #tpu.memory_space<vmem>>, vector<1x8x128xf32>
    %101 = vector.shape_cast %100 : vector<1x8x128xf32> to vector<8x128xf32>
    %102 = vector.shape_cast %98 : vector<8x128xf32> to vector<1x8x128xf32>
    tpu.vector_store %arg9[%99, %c0_31, %c0_32], %102 {strides = array<i32>} : memref<4x8x128xf32, #tpu.memory_space<vmem>>, vector<1x8x128xf32>,
    %103 = vector.shape_cast %94 : vector<8x1xi1> to vector<8x1xi1>
    %104 = vector.broadcast %103 : vector<8x1xi1> to vector<8x128xi1>
    %105 = arith.select %104, %91, %12 : vector<8x128xi1>, vector<8x128xf32>
    %c1_i32_33 = arith.constant 1 : i32
    %106 = arith.index_cast %c1_i32_33 : i32 to index
    %c0_34 = arith.constant 0 : index
    %c0_35 = arith.constant 0 : index
    %107 = vector.load %arg2[%106, %c0_34, %c0_35] : memref<4x8x384xf32, #tpu.memory_space<vmem>>, vector<1x8x384xf32>
    %108 = vector.shape_cast %107 : vector<1x8x384xf32> to vector<8x384xf32>
    %cst_36 = arith.constant dense<0.000000e+00> : vector<8x384xf32>
    %109 = tpu.matmul %58, %4, %cst_36 {dimension_numbers = #tpu.dot_dimension_numbers<[1], [0], [0], [1], [0, 0, 1, 1], [], []>} : vector<8x128xf32>, vector<128x384xf32>, vector<8x384xf32> -> vector<8x384xf32>
    %110 = vector.extract_strided_slice %108 {offsets = [0, 0], sizes = [8, 128], strides = [1, 1]} : vector<8x384xf32> to vector<8x128xf32>
    %111 = vector.extract_strided_slice %109 {offsets = [0, 0], sizes = [8, 128], strides = [1, 1]} : vector<8x384xf32> to vector<8x128xf32>
    %112 = arith.addf %110, %111 : vector<8x128xf32>
    %113 = arith.negf %112 : vector<8x128xf32>
    %114 = math.exp %113 : vector<8x128xf32>
    %cst_37 = arith.constant 1.000000e+00 : f32
    %115 = vector.broadcast %cst_37 : f32 to vector<8x128xf32>
    %116 = arith.addf %115, %114 : vector<8x128xf32>
    %117 = arith.divf %115, %116 : vector<8x128xf32>
    %118 = vector.extract_strided_slice %108 {offsets = [0, 128], sizes = [8, 128], strides = [1, 1]} : vector<8x384xf32> to vector<8x128xf32>
    %119 = vector.extract_strided_slice %109 {offsets = [0, 128], sizes = [8, 128], strides = [1, 1]} : vector<8x384xf32> to vector<8x128xf32>
    %120 = arith.addf %118, %119 : vector<8x128xf32>
    %121 = arith.negf %120 : vector<8x128xf32>
    %122 = math.exp %121 : vector<8x128xf32>
    %cst_38 = arith.constant 1.000000e+00 : f32
    %123 = vector.broadcast %cst_38 : f32 to vector<8x128xf32>
    %124 = arith.addf %123, %122 : vector<8x128xf32>
    %125 = arith.divf %123, %124 : vector<8x128xf32>
    %126 = vector.extract_strided_slice %108 {offsets = [0, 256], sizes = [8, 128], strides = [1, 1]} : vector<8x384xf32> to vector<8x128xf32>
    %127 = vector.extract_strided_slice %109 {offsets = [0, 256], sizes = [8, 128], strides = [1, 1]} : vector<8x384xf32> to vector<8x128xf32>
    %128 = vector.broadcast %6 : vector<1x128xf32> to vector<8x128xf32>
    %129 = arith.addf %127, %128 : vector<8x128xf32>
    %130 = arith.mulf %117, %129 : vector<8x128xf32>
    %131 = arith.addf %126, %130 : vector<8x128xf32>
    %132 = math.tanh %131 : vector<8x128xf32>
    %cst_39 = arith.constant 1.000000e+00 : f32
    %133 = vector.broadcast %cst_39 : f32 to vector<8x128xf32>
    %134 = arith.subf %133, %125 : vector<8x128xf32>
    %135 = arith.mulf %134, %132 : vector<8x128xf32>
    %136 = arith.mulf %125, %58 : vector<8x128xf32>
    %137 = arith.addf %135, %136 : vector<8x128xf32>
    %138 = arith.addi %8, %c1_i32_33 : i32
    %139 = vector.broadcast %138 : i32 to vector<8x1xi32>
    %140 = arith.cmpi slt, %139, %3 : vector<8x1xi32>
    %cst_40 = arith.constant 0.000000e+00 : f32
    %141 = vector.shape_cast %140 : vector<8x1xi1> to vector<8x1xi1>
    %142 = vector.broadcast %141 : vector<8x1xi1> to vector<8x128xi1>
    %143 = vector.broadcast %cst_40 : f32 to vector<8x128xf32>
    %144 = arith.select %142, %137, %143 : vector<8x128xi1>, vector<8x128xf32>
    %145 = arith.index_cast %c1_i32_33 : i32 to index
    %c0_41 = arith.constant 0 : index
    %c0_42 = arith.constant 0 : index
    %146 = vector.load %arg8[%145, %c0_41, %c0_42] : memref<4x8x128xf32, #tpu.memory_space<vmem>>, vector<1x8x128xf32>
    %147 = vector.shape_cast %146 : vector<1x8x128xf32> to vector<8x128xf32>
    %148 = vector.shape_cast %144 : vector<8x128xf32> to vector<1x8x128xf32>
    tpu.vector_store %arg8[%145, %c0_41, %c0_42], %148 {strides = array<i32>} : memref<4x8x128xf32, #tpu.memory_space<vmem>>, vector<1x8x128xf32>,
    %149 = vector.shape_cast %140 : vector<8x1xi1> to vector<8x1xi1>
    %150 = vector.broadcast %149 : vector<8x1xi1> to vector<8x128xi1>
    %151 = arith.select %150, %137, %58 : vector<8x128xi1>, vector<8x128xf32>
    %c3_i32_43 = arith.constant 3 : i32
    %152 = arith.subi %c3_i32_43, %c1_i32_33 : i32
    %153 = arith.index_cast %152 : i32 to index
    %c0_44 = arith.constant 0 : index
    %c0_45 = arith.constant 0 : index
    %154 = vector.load %arg3[%153, %c0_44, %c0_45] : memref<4x8x384xf32, #tpu.memory_space<vmem>>, vector<1x8x384xf32>
    %155 = vector.shape_cast %154 : vector<1x8x384xf32> to vector<8x384xf32>
    %cst_46 = arith.constant dense<0.000000e+00> : vector<8x384xf32>
    %156 = tpu.matmul %105, %5, %cst_46 {dimension_numbers = #tpu.dot_dimension_numbers<[1], [0], [0], [1], [0, 0, 1, 1], [], []>} : vector<8x128xf32>, vector<128x384xf32>, vector<8x384xf32> -> vector<8x384xf32>
    %157 = vector.extract_strided_slice %155 {offsets = [0, 0], sizes = [8, 128], strides = [1, 1]} : vector<8x384xf32> to vector<8x128xf32>
    %158 = vector.extract_strided_slice %156 {offsets = [0, 0], sizes = [8, 128], strides = [1, 1]} : vector<8x384xf32> to vector<8x128xf32>
    %159 = arith.addf %157, %158 : vector<8x128xf32>
    %160 = arith.negf %159 : vector<8x128xf32>
    %161 = math.exp %160 : vector<8x128xf32>
    %cst_47 = arith.constant 1.000000e+00 : f32
    %162 = vector.broadcast %cst_47 : f32 to vector<8x128xf32>
    %163 = arith.addf %162, %161 : vector<8x128xf32>
    %164 = arith.divf %162, %163 : vector<8x128xf32>
    %165 = vector.extract_strided_slice %155 {offsets = [0, 128], sizes = [8, 128], strides = [1, 1]} : vector<8x384xf32> to vector<8x128xf32>
    %166 = vector.extract_strided_slice %156 {offsets = [0, 128], sizes = [8, 128], strides = [1, 1]} : vector<8x384xf32> to vector<8x128xf32>
    %167 = arith.addf %165, %166 : vector<8x128xf32>
    %168 = arith.negf %167 : vector<8x128xf32>
    %169 = math.exp %168 : vector<8x128xf32>
    %cst_48 = arith.constant 1.000000e+00 : f32
    %170 = vector.broadcast %cst_48 : f32 to vector<8x128xf32>
    %171 = arith.addf %170, %169 : vector<8x128xf32>
    %172 = arith.divf %170, %171 : vector<8x128xf32>
    %173 = vector.extract_strided_slice %155 {offsets = [0, 256], sizes = [8, 128], strides = [1, 1]} : vector<8x384xf32> to vector<8x128xf32>
    %174 = vector.extract_strided_slice %156 {offsets = [0, 256], sizes = [8, 128], strides = [1, 1]} : vector<8x384xf32> to vector<8x128xf32>
    %175 = vector.broadcast %7 : vector<1x128xf32> to vector<8x128xf32>
    %176 = arith.addf %174, %175 : vector<8x128xf32>
    %177 = arith.mulf %164, %176 : vector<8x128xf32>
    %178 = arith.addf %173, %177 : vector<8x128xf32>
    %179 = math.tanh %178 : vector<8x128xf32>
    %cst_49 = arith.constant 1.000000e+00 : f32
    %180 = vector.broadcast %cst_49 : f32 to vector<8x128xf32>
    %181 = arith.subf %180, %172 : vector<8x128xf32>
    %182 = arith.mulf %181, %179 : vector<8x128xf32>
    %183 = arith.mulf %172, %105 : vector<8x128xf32>
    %184 = arith.addf %182, %183 : vector<8x128xf32>
    %185 = arith.addi %10, %152 : i32
    %186 = vector.broadcast %185 : i32 to vector<8x1xi32>
    %187 = arith.cmpi slt, %186, %3 : vector<8x1xi32>
    %cst_50 = arith.constant 0.000000e+00 : f32
    %188 = vector.shape_cast %187 : vector<8x1xi1> to vector<8x1xi1>
    %189 = vector.broadcast %188 : vector<8x1xi1> to vector<8x128xi1>
    %190 = vector.broadcast %cst_50 : f32 to vector<8x128xf32>
    %191 = arith.select %189, %184, %190 : vector<8x128xi1>, vector<8x128xf32>
    %192 = arith.index_cast %152 : i32 to index
    %c0_51 = arith.constant 0 : index
    %c0_52 = arith.constant 0 : index
    %193 = vector.load %arg9[%192, %c0_51, %c0_52] : memref<4x8x128xf32, #tpu.memory_space<vmem>>, vector<1x8x128xf32>
    %194 = vector.shape_cast %193 : vector<1x8x128xf32> to vector<8x128xf32>
    %195 = vector.shape_cast %191 : vector<8x128xf32> to vector<1x8x128xf32>
    tpu.vector_store %arg9[%192, %c0_51, %c0_52], %195 {strides = array<i32>} : memref<4x8x128xf32, #tpu.memory_space<vmem>>, vector<1x8x128xf32>,
    %196 = vector.shape_cast %187 : vector<8x1xi1> to vector<8x1xi1>
    %197 = vector.broadcast %196 : vector<8x1xi1> to vector<8x128xi1>
    %198 = arith.select %197, %184, %105 : vector<8x128xi1>, vector<8x128xf32>
    %c2_i32 = arith.constant 2 : i32
    %199 = arith.index_cast %c2_i32 : i32 to index
    %c0_53 = arith.constant 0 : index
    %c0_54 = arith.constant 0 : index
    %200 = vector.load %arg2[%199, %c0_53, %c0_54] : memref<4x8x384xf32, #tpu.memory_space<vmem>>, vector<1x8x384xf32>
    %201 = vector.shape_cast %200 : vector<1x8x384xf32> to vector<8x384xf32>
    %cst_55 = arith.constant dense<0.000000e+00> : vector<8x384xf32>
    %202 = tpu.matmul %151, %4, %cst_55 {dimension_numbers = #tpu.dot_dimension_numbers<[1], [0], [0], [1], [0, 0, 1, 1], [], []>} : vector<8x128xf32>, vector<128x384xf32>, vector<8x384xf32> -> vector<8x384xf32>
    %203 = vector.extract_strided_slice %201 {offsets = [0, 0], sizes = [8, 128], strides = [1, 1]} : vector<8x384xf32> to vector<8x128xf32>
    %204 = vector.extract_strided_slice %202 {offsets = [0, 0], sizes = [8, 128], strides = [1, 1]} : vector<8x384xf32> to vector<8x128xf32>
    %205 = arith.addf %203, %204 : vector<8x128xf32>
    %206 = arith.negf %205 : vector<8x128xf32>
    %207 = math.exp %206 : vector<8x128xf32>
    %cst_56 = arith.constant 1.000000e+00 : f32
    %208 = vector.broadcast %cst_56 : f32 to vector<8x128xf32>
    %209 = arith.addf %208, %207 : vector<8x128xf32>
    %210 = arith.divf %208, %209 : vector<8x128xf32>
    %211 = vector.extract_strided_slice %201 {offsets = [0, 128], sizes = [8, 128], strides = [1, 1]} : vector<8x384xf32> to vector<8x128xf32>
    %212 = vector.extract_strided_slice %202 {offsets = [0, 128], sizes = [8, 128], strides = [1, 1]} : vector<8x384xf32> to vector<8x128xf32>
    %213 = arith.addf %211, %212 : vector<8x128xf32>
    %214 = arith.negf %213 : vector<8x128xf32>
    %215 = math.exp %214 : vector<8x128xf32>
    %cst_57 = arith.constant 1.000000e+00 : f32
    %216 = vector.broadcast %cst_57 : f32 to vector<8x128xf32>
    %217 = arith.addf %216, %215 : vector<8x128xf32>
    %218 = arith.divf %216, %217 : vector<8x128xf32>
    %219 = vector.extract_strided_slice %201 {offsets = [0, 256], sizes = [8, 128], strides = [1, 1]} : vector<8x384xf32> to vector<8x128xf32>
    %220 = vector.extract_strided_slice %202 {offsets = [0, 256], sizes = [8, 128], strides = [1, 1]} : vector<8x384xf32> to vector<8x128xf32>
    %221 = vector.broadcast %6 : vector<1x128xf32> to vector<8x128xf32>
    %222 = arith.addf %220, %221 : vector<8x128xf32>
    %223 = arith.mulf %210, %222 : vector<8x128xf32>
    %224 = arith.addf %219, %223 : vector<8x128xf32>
    %225 = math.tanh %224 : vector<8x128xf32>
    %cst_58 = arith.constant 1.000000e+00 : f32
    %226 = vector.broadcast %cst_58 : f32 to vector<8x128xf32>
    %227 = arith.subf %226, %218 : vector<8x128xf32>
    %228 = arith.mulf %227, %225 : vector<8x128xf32>
    %229 = arith.mulf %218, %151 : vector<8x128xf32>
    %230 = arith.addf %228, %229 : vector<8x128xf32>
    %231 = arith.addi %8, %c2_i32 : i32
    %232 = vector.broadcast %231 : i32 to vector<8x1xi32>
    %233 = arith.cmpi slt, %232, %3 : vector<8x1xi32>
    %cst_59 = arith.constant 0.000000e+00 : f32
    %234 = vector.shape_cast %233 : vector<8x1xi1> to vector<8x1xi1>
    %235 = vector.broadcast %234 : vector<8x1xi1> to vector<8x128xi1>
    %236 = vector.broadcast %cst_59 : f32 to vector<8x128xf32>
    %237 = arith.select %235, %230, %236 : vector<8x128xi1>, vector<8x128xf32>
    %238 = arith.index_cast %c2_i32 : i32 to index
    %c0_60 = arith.constant 0 : index
    %c0_61 = arith.constant 0 : index
    %239 = vector.load %arg8[%238, %c0_60, %c0_61] : memref<4x8x128xf32, #tpu.memory_space<vmem>>, vector<1x8x128xf32>
    %240 = vector.shape_cast %239 : vector<1x8x128xf32> to vector<8x128xf32>
    %241 = vector.shape_cast %237 : vector<8x128xf32> to vector<1x8x128xf32>
    tpu.vector_store %arg8[%238, %c0_60, %c0_61], %241 {strides = array<i32>} : memref<4x8x128xf32, #tpu.memory_space<vmem>>, vector<1x8x128xf32>,
    %242 = vector.shape_cast %233 : vector<8x1xi1> to vector<8x1xi1>
    %243 = vector.broadcast %242 : vector<8x1xi1> to vector<8x128xi1>
    %244 = arith.select %243, %230, %151 : vector<8x128xi1>, vector<8x128xf32>
    %c3_i32_62 = arith.constant 3 : i32
    %245 = arith.subi %c3_i32_62, %c2_i32 : i32
    %246 = arith.index_cast %245 : i32 to index
    %c0_63 = arith.constant 0 : index
    %c0_64 = arith.constant 0 : index
    %247 = vector.load %arg3[%246, %c0_63, %c0_64] : memref<4x8x384xf32, #tpu.memory_space<vmem>>, vector<1x8x384xf32>
    %248 = vector.shape_cast %247 : vector<1x8x384xf32> to vector<8x384xf32>
    %cst_65 = arith.constant dense<0.000000e+00> : vector<8x384xf32>
    %249 = tpu.matmul %198, %5, %cst_65 {dimension_numbers = #tpu.dot_dimension_numbers<[1], [0], [0], [1], [0, 0, 1, 1], [], []>} : vector<8x128xf32>, vector<128x384xf32>, vector<8x384xf32> -> vector<8x384xf32>
    %250 = vector.extract_strided_slice %248 {offsets = [0, 0], sizes = [8, 128], strides = [1, 1]} : vector<8x384xf32> to vector<8x128xf32>
    %251 = vector.extract_strided_slice %249 {offsets = [0, 0], sizes = [8, 128], strides = [1, 1]} : vector<8x384xf32> to vector<8x128xf32>
    %252 = arith.addf %250, %251 : vector<8x128xf32>
    %253 = arith.negf %252 : vector<8x128xf32>
    %254 = math.exp %253 : vector<8x128xf32>
    %cst_66 = arith.constant 1.000000e+00 : f32
    %255 = vector.broadcast %cst_66 : f32 to vector<8x128xf32>
    %256 = arith.addf %255, %254 : vector<8x128xf32>
    %257 = arith.divf %255, %256 : vector<8x128xf32>
    %258 = vector.extract_strided_slice %248 {offsets = [0, 128], sizes = [8, 128], strides = [1, 1]} : vector<8x384xf32> to vector<8x128xf32>
    %259 = vector.extract_strided_slice %249 {offsets = [0, 128], sizes = [8, 128], strides = [1, 1]} : vector<8x384xf32> to vector<8x128xf32>
    %260 = arith.addf %258, %259 : vector<8x128xf32>
    %261 = arith.negf %260 : vector<8x128xf32>
    %262 = math.exp %261 : vector<8x128xf32>
    %cst_67 = arith.constant 1.000000e+00 : f32
    %263 = vector.broadcast %cst_67 : f32 to vector<8x128xf32>
    %264 = arith.addf %263, %262 : vector<8x128xf32>
    %265 = arith.divf %263, %264 : vector<8x128xf32>
    %266 = vector.extract_strided_slice %248 {offsets = [0, 256], sizes = [8, 128], strides = [1, 1]} : vector<8x384xf32> to vector<8x128xf32>
    %267 = vector.extract_strided_slice %249 {offsets = [0, 256], sizes = [8, 128], strides = [1, 1]} : vector<8x384xf32> to vector<8x128xf32>
    %268 = vector.broadcast %7 : vector<1x128xf32> to vector<8x128xf32>
    %269 = arith.addf %267, %268 : vector<8x128xf32>
    %270 = arith.mulf %257, %269 : vector<8x128xf32>
    %271 = arith.addf %266, %270 : vector<8x128xf32>
    %272 = math.tanh %271 : vector<8x128xf32>
    %cst_68 = arith.constant 1.000000e+00 : f32
    %273 = vector.broadcast %cst_68 : f32 to vector<8x128xf32>
    %274 = arith.subf %273, %265 : vector<8x128xf32>
    %275 = arith.mulf %274, %272 : vector<8x128xf32>
    %276 = arith.mulf %265, %198 : vector<8x128xf32>
    %277 = arith.addf %275, %276 : vector<8x128xf32>
    %278 = arith.addi %10, %245 : i32
    %279 = vector.broadcast %278 : i32 to vector<8x1xi32>
    %280 = arith.cmpi slt, %279, %3 : vector<8x1xi32>
    %cst_69 = arith.constant 0.000000e+00 : f32
    %281 = vector.shape_cast %280 : vector<8x1xi1> to vector<8x1xi1>
    %282 = vector.broadcast %281 : vector<8x1xi1> to vector<8x128xi1>
    %283 = vector.broadcast %cst_69 : f32 to vector<8x128xf32>
    %284 = arith.select %282, %277, %283 : vector<8x128xi1>, vector<8x128xf32>
    %285 = arith.index_cast %245 : i32 to index
    %c0_70 = arith.constant 0 : index
    %c0_71 = arith.constant 0 : index
    %286 = vector.load %arg9[%285, %c0_70, %c0_71] : memref<4x8x128xf32, #tpu.memory_space<vmem>>, vector<1x8x128xf32>
    %287 = vector.shape_cast %286 : vector<1x8x128xf32> to vector<8x128xf32>
    %288 = vector.shape_cast %284 : vector<8x128xf32> to vector<1x8x128xf32>
    tpu.vector_store %arg9[%285, %c0_70, %c0_71], %288 {strides = array<i32>} : memref<4x8x128xf32, #tpu.memory_space<vmem>>, vector<1x8x128xf32>,
    %289 = vector.shape_cast %280 : vector<8x1xi1> to vector<8x1xi1>
    %290 = vector.broadcast %289 : vector<8x1xi1> to vector<8x128xi1>
    %291 = arith.select %290, %277, %198 : vector<8x128xi1>, vector<8x128xf32>
    %c3_i32_72 = arith.constant 3 : i32
    %292 = arith.index_cast %c3_i32_72 : i32 to index
    %c0_73 = arith.constant 0 : index
    %c0_74 = arith.constant 0 : index
    %293 = vector.load %arg2[%292, %c0_73, %c0_74] : memref<4x8x384xf32, #tpu.memory_space<vmem>>, vector<1x8x384xf32>
    %294 = vector.shape_cast %293 : vector<1x8x384xf32> to vector<8x384xf32>
    %cst_75 = arith.constant dense<0.000000e+00> : vector<8x384xf32>
    %295 = tpu.matmul %244, %4, %cst_75 {dimension_numbers = #tpu.dot_dimension_numbers<[1], [0], [0], [1], [0, 0, 1, 1], [], []>} : vector<8x128xf32>, vector<128x384xf32>, vector<8x384xf32> -> vector<8x384xf32>
    %296 = vector.extract_strided_slice %294 {offsets = [0, 0], sizes = [8, 128], strides = [1, 1]} : vector<8x384xf32> to vector<8x128xf32>
    %297 = vector.extract_strided_slice %295 {offsets = [0, 0], sizes = [8, 128], strides = [1, 1]} : vector<8x384xf32> to vector<8x128xf32>
    %298 = arith.addf %296, %297 : vector<8x128xf32>
    %299 = arith.negf %298 : vector<8x128xf32>
    %300 = math.exp %299 : vector<8x128xf32>
    %cst_76 = arith.constant 1.000000e+00 : f32
    %301 = vector.broadcast %cst_76 : f32 to vector<8x128xf32>
    %302 = arith.addf %301, %300 : vector<8x128xf32>
    %303 = arith.divf %301, %302 : vector<8x128xf32>
    %304 = vector.extract_strided_slice %294 {offsets = [0, 128], sizes = [8, 128], strides = [1, 1]} : vector<8x384xf32> to vector<8x128xf32>
    %305 = vector.extract_strided_slice %295 {offsets = [0, 128], sizes = [8, 128], strides = [1, 1]} : vector<8x384xf32> to vector<8x128xf32>
    %306 = arith.addf %304, %305 : vector<8x128xf32>
    %307 = arith.negf %306 : vector<8x128xf32>
    %308 = math.exp %307 : vector<8x128xf32>
    %cst_77 = arith.constant 1.000000e+00 : f32
    %309 = vector.broadcast %cst_77 : f32 to vector<8x128xf32>
    %310 = arith.addf %309, %308 : vector<8x128xf32>
    %311 = arith.divf %309, %310 : vector<8x128xf32>
    %312 = vector.extract_strided_slice %294 {offsets = [0, 256], sizes = [8, 128], strides = [1, 1]} : vector<8x384xf32> to vector<8x128xf32>
    %313 = vector.extract_strided_slice %295 {offsets = [0, 256], sizes = [8, 128], strides = [1, 1]} : vector<8x384xf32> to vector<8x128xf32>
    %314 = vector.broadcast %6 : vector<1x128xf32> to vector<8x128xf32>
    %315 = arith.addf %313, %314 : vector<8x128xf32>
    %316 = arith.mulf %303, %315 : vector<8x128xf32>
    %317 = arith.addf %312, %316 : vector<8x128xf32>
    %318 = math.tanh %317 : vector<8x128xf32>
    %cst_78 = arith.constant 1.000000e+00 : f32
    %319 = vector.broadcast %cst_78 : f32 to vector<8x128xf32>
    %320 = arith.subf %319, %311 : vector<8x128xf32>
    %321 = arith.mulf %320, %318 : vector<8x128xf32>
    %322 = arith.mulf %311, %244 : vector<8x128xf32>
    %323 = arith.addf %321, %322 : vector<8x128xf32>
    %324 = arith.addi %8, %c3_i32_72 : i32
    %325 = vector.broadcast %324 : i32 to vector<8x1xi32>
    %326 = arith.cmpi slt, %325, %3 : vector<8x1xi32>
    %cst_79 = arith.constant 0.000000e+00 : f32
    %327 = vector.shape_cast %326 : vector<8x1xi1> to vector<8x1xi1>
    %328 = vector.broadcast %327 : vector<8x1xi1> to vector<8x128xi1>
    %329 = vector.broadcast %cst_79 : f32 to vector<8x128xf32>
    %330 = arith.select %328, %323, %329 : vector<8x128xi1>, vector<8x128xf32>
    %331 = arith.index_cast %c3_i32_72 : i32 to index
    %c0_80 = arith.constant 0 : index
    %c0_81 = arith.constant 0 : index
    %332 = vector.load %arg8[%331, %c0_80, %c0_81] : memref<4x8x128xf32, #tpu.memory_space<vmem>>, vector<1x8x128xf32>
    %333 = vector.shape_cast %332 : vector<1x8x128xf32> to vector<8x128xf32>
    %334 = vector.shape_cast %330 : vector<8x128xf32> to vector<1x8x128xf32>
    tpu.vector_store %arg8[%331, %c0_80, %c0_81], %334 {strides = array<i32>} : memref<4x8x128xf32, #tpu.memory_space<vmem>>, vector<1x8x128xf32>,
    %335 = vector.shape_cast %326 : vector<8x1xi1> to vector<8x1xi1>
    %336 = vector.broadcast %335 : vector<8x1xi1> to vector<8x128xi1>
    %337 = arith.select %336, %323, %244 : vector<8x128xi1>, vector<8x128xf32>
    %c3_i32_82 = arith.constant 3 : i32
    %338 = arith.subi %c3_i32_82, %c3_i32_72 : i32
    %339 = arith.index_cast %338 : i32 to index
    %c0_83 = arith.constant 0 : index
    %c0_84 = arith.constant 0 : index
    %340 = vector.load %arg3[%339, %c0_83, %c0_84] : memref<4x8x384xf32, #tpu.memory_space<vmem>>, vector<1x8x384xf32>
    %341 = vector.shape_cast %340 : vector<1x8x384xf32> to vector<8x384xf32>
    %cst_85 = arith.constant dense<0.000000e+00> : vector<8x384xf32>
    %342 = tpu.matmul %291, %5, %cst_85 {dimension_numbers = #tpu.dot_dimension_numbers<[1], [0], [0], [1], [0, 0, 1, 1], [], []>} : vector<8x128xf32>, vector<128x384xf32>, vector<8x384xf32> -> vector<8x384xf32>
    %343 = vector.extract_strided_slice %341 {offsets = [0, 0], sizes = [8, 128], strides = [1, 1]} : vector<8x384xf32> to vector<8x128xf32>
    %344 = vector.extract_strided_slice %342 {offsets = [0, 0], sizes = [8, 128], strides = [1, 1]} : vector<8x384xf32> to vector<8x128xf32>
    %345 = arith.addf %343, %344 : vector<8x128xf32>
    %346 = arith.negf %345 : vector<8x128xf32>
    %347 = math.exp %346 : vector<8x128xf32>
    %cst_86 = arith.constant 1.000000e+00 : f32
    %348 = vector.broadcast %cst_86 : f32 to vector<8x128xf32>
    %349 = arith.addf %348, %347 : vector<8x128xf32>
    %350 = arith.divf %348, %349 : vector<8x128xf32>
    %351 = vector.extract_strided_slice %341 {offsets = [0, 128], sizes = [8, 128], strides = [1, 1]} : vector<8x384xf32> to vector<8x128xf32>
    %352 = vector.extract_strided_slice %342 {offsets = [0, 128], sizes = [8, 128], strides = [1, 1]} : vector<8x384xf32> to vector<8x128xf32>
    %353 = arith.addf %351, %352 : vector<8x128xf32>
    %354 = arith.negf %353 : vector<8x128xf32>
    %355 = math.exp %354 : vector<8x128xf32>
    %cst_87 = arith.constant 1.000000e+00 : f32
    %356 = vector.broadcast %cst_87 : f32 to vector<8x128xf32>
    %357 = arith.addf %356, %355 : vector<8x128xf32>
    %358 = arith.divf %356, %357 : vector<8x128xf32>
    %359 = vector.extract_strided_slice %341 {offsets = [0, 256], sizes = [8, 128], strides = [1, 1]} : vector<8x384xf32> to vector<8x128xf32>
    %360 = vector.extract_strided_slice %342 {offsets = [0, 256], sizes = [8, 128], strides = [1, 1]} : vector<8x384xf32> to vector<8x128xf32>
    %361 = vector.broadcast %7 : vector<1x128xf32> to vector<8x128xf32>
    %362 = arith.addf %360, %361 : vector<8x128xf32>
    %363 = arith.mulf %350, %362 : vector<8x128xf32>
    %364 = arith.addf %359, %363 : vector<8x128xf32>
    %365 = math.tanh %364 : vector<8x128xf32>
    %cst_88 = arith.constant 1.000000e+00 : f32
    %366 = vector.broadcast %cst_88 : f32 to vector<8x128xf32>
    %367 = arith.subf %366, %358 : vector<8x128xf32>
    %368 = arith.mulf %367, %365 : vector<8x128xf32>
    %369 = arith.mulf %358, %291 : vector<8x128xf32>
    %370 = arith.addf %368, %369 : vector<8x128xf32>
    %371 = arith.addi %10, %338 : i32
    %372 = vector.broadcast %371 : i32 to vector<8x1xi32>
    %373 = arith.cmpi slt, %372, %3 : vector<8x1xi32>
    %cst_89 = arith.constant 0.000000e+00 : f32
    %374 = vector.shape_cast %373 : vector<8x1xi1> to vector<8x1xi1>
    %375 = vector.broadcast %374 : vector<8x1xi1> to vector<8x128xi1>
    %376 = vector.broadcast %cst_89 : f32 to vector<8x128xf32>
    %377 = arith.select %375, %370, %376 : vector<8x128xi1>, vector<8x128xf32>
    %378 = arith.index_cast %338 : i32 to index
    %c0_90 = arith.constant 0 : index
    %c0_91 = arith.constant 0 : index
    %379 = vector.load %arg9[%378, %c0_90, %c0_91] : memref<4x8x128xf32, #tpu.memory_space<vmem>>, vector<1x8x128xf32>
    %380 = vector.shape_cast %379 : vector<1x8x128xf32> to vector<8x128xf32>
    %381 = vector.shape_cast %377 : vector<8x128xf32> to vector<1x8x128xf32>
    tpu.vector_store %arg9[%378, %c0_90, %c0_91], %381 {strides = array<i32>} : memref<4x8x128xf32, #tpu.memory_space<vmem>>, vector<1x8x128xf32>,
    %382 = vector.shape_cast %373 : vector<8x1xi1> to vector<8x1xi1>
    %383 = vector.broadcast %382 : vector<8x1xi1> to vector<8x128xi1>
    %384 = arith.select %383, %370, %291 : vector<8x128xi1>, vector<8x128xf32>
    %c4_i32_92 = arith.constant 4 : i32
    %c0_93 = arith.constant 0 : index
    %c0_94 = arith.constant 0 : index
    %385 = vector.load %arg12[%c0_93, %c0_94] : memref<8x128xf32, #tpu.memory_space<vmem>>, vector<8x128xf32>
    tpu.vector_store %arg12[%c0_93, %c0_94], %337 {strides = array<i32>} : memref<8x128xf32, #tpu.memory_space<vmem>>, vector<8x128xf32>,
    %c0_95 = arith.constant 0 : index
    %c0_96 = arith.constant 0 : index
    %386 = vector.load %arg13[%c0_95, %c0_96] : memref<8x128xf32, #tpu.memory_space<vmem>>, vector<8x128xf32>
    tpu.vector_store %arg13[%c0_95, %c0_96], %384 {strides = array<i32>} : memref<8x128xf32, #tpu.memory_space<vmem>>, vector<8x128xf32>,
    %c0_97 = arith.constant 0 : index
    %c0_98 = arith.constant 0 : index
    %387 = vector.load %arg10[%c0_97, %c0_98] : memref<8x128xf32, #tpu.memory_space<vmem>>, vector<8x128xf32>
    tpu.vector_store %arg10[%c0_97, %c0_98], %337 {strides = array<i32>} : memref<8x128xf32, #tpu.memory_space<vmem>>, vector<8x128xf32>,
    %c0_99 = arith.constant 0 : index
    %c0_100 = arith.constant 0 : index
    %388 = vector.load %arg11[%c0_99, %c0_100] : memref<8x128xf32, #tpu.memory_space<vmem>>, vector<8x128xf32>
    tpu.vector_store %arg11[%c0_99, %c0_100], %384 {strides = array<i32>} : memref<8x128xf32, #tpu.memory_space<vmem>>, vector<8x128xf32>,
    return
  }
  func.func @transform_0(%arg0: i32) -> (i32, i32) {
    %c0_i32 = arith.constant 0 : i32
    %c0_i32_0 = arith.constant 0 : i32
    %c0_i32_1 = arith.constant 0 : i32
    return %c0_i32, %c0_i32_0 : i32, i32
  }
  func.func @transform_1(%arg0: i32) -> (i32, i32, i32) {
    %c0_i32 = arith.constant 0 : i32
    %c0_i32_0 = arith.constant 0 : i32
    %c0_i32_1 = arith.constant 0 : i32
    return %arg0, %c0_i32, %c0_i32_0 : i32, i32, i32
  }
  func.func @transform_2(%arg0: i32) -> (i32, i32, i32) {
    %c1_i32 = arith.constant 1 : i32
    %0 = arith.subi %c1_i32, %arg0 : i32
    %c0_i32 = arith.constant 0 : i32
    %c0_i32_0 = arith.constant 0 : i32
    %c0_i32_1 = arith.constant 0 : i32
    return %0, %c0_i32, %c0_i32_0 : i32, i32, i32
  }
  func.func @transform_3(%arg0: i32) -> (i32, i32) {
    %c0_i32 = arith.constant 0 : i32
    %c0_i32_0 = arith.constant 0 : i32
    %c0_i32_1 = arith.constant 0 : i32
    return %c0_i32, %c0_i32_0 : i32, i32
  }
  func.func @transform_4(%arg0: i32) -> (i32, i32) {
    %c0_i32 = arith.constant 0 : i32
    %c0_i32_0 = arith.constant 0 : i32
    %c0_i32_1 = arith.constant 0 : i32
    return %c0_i32, %c0_i32_0 : i32, i32
  }
  func.func @transform_5(%arg0: i32) -> (i32, i32) {
    %c0_i32 = arith.constant 0 : i32
    %c0_i32_0 = arith.constant 0 : i32
    %c0_i32_1 = arith.constant 0 : i32
    return %c0_i32, %c0_i32_0 : i32, i32
  }
  func.func @transform_6(%arg0: i32) -> (i32, i32) {
    %c0_i32 = arith.constant 0 : i32
    %c0_i32_0 = arith.constant 0 : i32
    %c0_i32_1 = arith.constant 0 : i32
    return %c0_i32, %c0_i32_0 : i32, i32
  }
  func.func @transform_7(%arg0: i32) -> (i32, i32, i32) {
    %c0_i32 = arith.constant 0 : i32
    %c0_i32_0 = arith.constant 0 : i32
    %c0_i32_1 = arith.constant 0 : i32
    return %arg0, %c0_i32, %c0_i32_0 : i32, i32, i32
  }
  func.func @transform_8(%arg0: i32) -> (i32, i32, i32) {
    %c1_i32 = arith.constant 1 : i32
    %0 = arith.subi %c1_i32, %arg0 : i32
    %c0_i32 = arith.constant 0 : i32
    %c0_i32_0 = arith.constant 0 : i32
    %c0_i32_1 = arith.constant 0 : i32
    return %0, %c0_i32, %c0_i32_0 : i32, i32, i32
  }
  func.func @transform_9(%arg0: i32) -> (i32, i32) {
    %c0_i32 = arith.constant 0 : i32
    %c0_i32_0 = arith.constant 0 : i32
    %c0_i32_1 = arith.constant 0 : i32
    return %c0_i32, %c0_i32_0 : i32, i32
  }
  func.func @transform_10(%arg0: i32) -> (i32, i32) {
    %c0_i32 = arith.constant 0 : i32
    %c0_i32_0 = arith.constant 0 : i32
    %c0_i32_1 = arith.constant 0 : i32
    return %c0_i32, %c0_i32_0 : i32, i32
  }
}

</mosaic_0001>

<bundles_post_ra>
// kernel: encoder_rnn_forward.2
= control target key start
LH: loop header
LB: loop body
LE: loop exit
PB: predicated region body
PF: predicated region fallthrough
CT: control target
= control target key end

     0   :  { %s905_s15 = smov 0   ;;  %s1297_s0 = inlined_call_operand.vmem [shape: f32[64,128], index: 0, kind: input, shape index: {}]   ;;  %s1298_s1 = inlined_call_operand.vmem [shape: f32[128,768], index: 1, kind: input, shape index: {}]   ;;  %s1299_s2 = inlined_call_operand.vmem [shape: f32[1,768], index: 2, kind: input, shape index: {}]   ;;  %s1300_s3 = inlined_call_operand.vmem [shape: f32[64,384], index: 3, kind: output, shape index: {0}]   ;;  %s1301_s4 = inlined_call_operand.vmem [shape: f32[64,384], index: 4, kind: output, shape index: {1}]  }
   0x1 LB: > { %s736_s16 = sadd.s32 4294967295, %s877_s15   ;;  %p740_p0 = scmp.ge.s32.totalorder %s877_s15, 1  ;;  %s877_s15 = sphi %s905_s15, %s15_s15  }
   0x2   : > { %p166_p1 = scmp.lt.s32.totalorder %s877_s15, 3 }
   0x4   : > { %p167_p2 = pnand %p740_p0, %p166_p1 }
   0x5   : > { %v224_v0 = vld [vmem:[%s1298_s1 + $0x8] sm:$0xff] (!%p167_p2)  ;;  %v230_v1 = vld [vmem:[%s1298_s1 + $0x38] sm:$0xff] (!%p167_p2)  ;;  %v223_v2 = vld [vmem:[%s1298_s1] sm:$0xff] (!%p167_p2)  ;;  %v879_v7 = vmov (!%p167_p2), 0.0   ;;  %s1049_s7 = sshll.u32 (!%p167_p2), %s736_s16, 2 }
   0x6   : > { %170 = sbr.rel (%p167_p2) target bundleno = 293 (0x125), region = 32  ;;  %v749_v3 = vpack.c.bf16 (!%p167_p2), %v230_v1, %v224_v0  ;;  %v229_v4 = vld [vmem:[%s1298_s1 + $0x30] sm:$0xff] (!%p167_p2)  ;;  %v226_v5 = vld [vmem:[%s1298_s1 + $0x18] sm:$0xff] (!%p167_p2)  ;;  %v232_v6 = vld [vmem:[%s1298_s1 + $0x48] sm:$0xff] (!%p167_p2)  ;;  %415 = vmatprep.mubr.f32.mxu0 (!%p167_p2), %v879_v7  ;;  %504 = vmatprep.mubr.f32.mxu1 (!%p167_p2), %v879_v7  ;;  %p200_p3 = scmp.lt.s32.totalorder (!%p167_p2), %s1049_s7, 7 }
   0x7   : > { %v751_v8 = vpack.c.bf16 (!%p167_p2), %v229_v4, %v223_v2  ;;  %v781_v9 = vpack.c.bf16 (!%p167_p2), %v232_v6, %v226_v5  ;;  %v225_v10 = vld [vmem:[%s1298_s1 + $0x10] sm:$0xff] (!%p167_p2)  ;;  %v231_v11 = vld [vmem:[%s1298_s1 + $0x40] sm:$0xff] (!%p167_p2)  ;;  %v236_v12 = vld [vmem:[%s1298_s1 + $0x68] sm:$0xff] (!%p167_p2) }
   0x8   : > { %750 = vmatprep.subr.bf16.mxu0 (!%p167_p2), %v749_v3  ;;  %v783_v13 = vpack.c.bf16 (!%p167_p2), %v231_v11, %v225_v10  ;;  %v242_v14 = vld [vmem:[%s1298_s1 + $0x98] sm:$0xff] (!%p167_p2)  ;;  %v235_v15 = vld [vmem:[%s1298_s1 + $0x60] sm:$0xff] (!%p167_p2)  ;;  %v241_v16 = vld [vmem:[%s1298_s1 + $0x90] sm:$0xff] (!%p167_p2) }
   0x9   : > { %752 = vmatpush1.bf16.msra.mxu0 (!%p167_p2), %v751_v8  ;;  %782 = vmatprep.subr.bf16.mxu1 (!%p167_p2), %v781_v9  ;;  %v753_v17 = vpack.c.bf16 (!%p167_p2), %v242_v14, %v236_v12  ;;  %v755_v18 = vpack.c.bf16 (!%p167_p2), %v241_v16, %v235_v15  ;;  %v238_v19 = vld [vmem:[%s1298_s1 + $0x78] sm:$0xff] (!%p167_p2)  ;;  %v244_v20 = vld [vmem:[%s1298_s1 + $0xa8] sm:$0xff] (!%p167_p2)  ;;  %v237_v21 = vld [vmem:[%s1298_s1 + $0x70] sm:$0xff] (!%p167_p2) }
   0xa   : > { %784 = vmatpush1.bf16.msra.mxu1 (!%p167_p2), %v783_v13  ;;  %v785_v22 = vpack.c.bf16 (!%p167_p2), %v244_v20, %v238_v19  ;;  %v243_v23 = vld [vmem:[%s1298_s1 + $0xa0] sm:$0xff] (!%p167_p2)  ;;  %v248_v24 = vld [vmem:[%s1298_s1 + $0xc8] sm:$0xff] (!%p167_p2)  ;;  %v254_v25 = vld [vmem:[%s1298_s1 + $0xf8] sm:$0xff] (!%p167_p2) }
   0xb   : > { %754 = vmatprep.subr.bf16.mxu0 (!%p167_p2), %v753_v17  ;;  %v787_v26 = vpack.c.bf16 (!%p167_p2), %v243_v23, %v237_v21  ;;  %v757_v27 = vpack.c.bf16 (!%p167_p2), %v254_v25, %v248_v24  ;;  %v247_v28 = vld [vmem:[%s1298_s1 + $0xc0] sm:$0xff] (!%p167_p2)  ;;  %v253_v29 = vld [vmem:[%s1298_s1 + $0xf0] sm:$0xff] (!%p167_p2)  ;;  %v250_v30 = vld [vmem:[%s1298_s1 + $0xd8] sm:$0xff] (!%p167_p2) }
   0xc   : > { %786 = vmatprep.subr.bf16.mxu1 (!%p167_p2), %v785_v22  ;;  %v256_v31 = vld [vmem:[%s1298_s1 + $0x108] sm:$0xff] (!%p167_p2)  ;;  %v249_v32 = vld [vmem:[%s1298_s1 + $0xd0] sm:$0xff] (!%p167_p2)  ;;  %v255_v33 = vld [vmem:[%s1298_s1 + $0x100] sm:$0xff] (!%p167_p2)  ;;  %v759_v34 = vpack.c.bf16 (!%p167_p2), %v253_v29, %v247_v28 }
   0xd   : > { %756 = vmatpush1.bf16.msra.mxu0 %v755_v18  ;;  %v789_v35 = vpack.c.bf16 %v256_v31, %v250_v30  ;;  %v260_v36 = vld [vmem:[%s1298_s1 + $0x128] sm:$0xff]  ;;  %v266_v37 = vld [vmem:[%s1298_s1 + $0x158] sm:$0xff]  ;;  %v259_v38 = vld [vmem:[%s1298_s1 + $0x120] sm:$0xff]  ;;  %v791_v39 = vpack.c.bf16 %v255_v33, %v249_v32  ;;  %s1303_s7 = smov (!%p200_p3, %s1049_s7), 7 }
   0xe   : > { %788 = vmatpush1.bf16.msra.mxu1 %v787_v26  ;;  %758 = vmatprep.subr.bf16.mxu0 %v757_v27  ;;  %v761_v40 = vpack.c.bf16 %v266_v37, %v260_v36  ;;  %v265_v41 = vld [vmem:[%s1298_s1 + $0x150] sm:$0xff]  ;;  %v262_v42 = vld [vmem:[%s1298_s1 + $0x138] sm:$0xff]  ;;  %v268_v43 = vld [vmem:[%s1298_s1 + $0x168] sm:$0xff]  ;;  %s742_s25 = sshll.u32 %s1303_s7, 3  ;;  %s861_s24 = smul.u32 24, %s1303_s7 }
   0xf   : > { %790 = vmatprep.subr.bf16.mxu1 %v789_v35  ;;  %v793_v44 = vpack.c.bf16 %v268_v43, %v262_v42  ;;  %v261_v45 = vld [vmem:[%s1298_s1 + $0x130] sm:$0xff]  ;;  %v267_v46 = vld [vmem:[%s1298_s1 + $0x160] sm:$0xff]  ;;  %v272_v47 = vld [vmem:[%s1298_s1 + $0x188] sm:$0xff]  ;;  %v763_v49 = vpack.c.bf16 %v265_v41, %v259_v38  ;;  %s1127_s6 = scalar_lea.vmem %s1297_s0, %s742_s25 }
  0x10   : > { %v278_v48 = vld [vmem:[%s1298_s1 + $0x1b8] sm:$0xff]  ;;  %v280_v51 = vld [vmem:[%s1298_s1 + $0x1c8] sm:$0xff]  ;;  %v795_v52 = vpack.c.bf16 %v267_v46, %v261_v45  ;;  %v271_v54 = vld [vmem:[%s1298_s1 + $0x180] sm:$0xff]  ;;  %s1261_s26 = scalar_lea.vmem %s1300_s3, %s861_s24  ;;  %s1266_s7 = scalar_lea.vmem %s1301_s4, %s861_s24 }
  0x11   : > { %760 = vmatpush1.bf16.msra.mxu0 %v759_v34  ;;  %v274_v50 = vld [vmem:[%s1298_s1 + $0x198] sm:$0xff]  ;;  %v765_v53 = vpack.c.bf16 %v278_v48, %v272_v47  ;;  %v277_v55 = vld [vmem:[%s1298_s1 + $0x1b0] sm:$0xff]  ;;  %v279_v58 = vld [vmem:[%s1298_s1 + $0x1c0] sm:$0xff] }
  0x12   : > { %792 = vmatpush1.bf16.msra.mxu1 %v791_v39  ;;  %762 = vmatprep.subr.bf16.mxu0 %v761_v40  ;;  %v273_v56 = vld [vmem:[%s1298_s1 + $0x190] sm:$0xff]  ;;  %v797_v57 = vpack.c.bf16 %v280_v51, %v274_v50  ;;  %v284_v59 = vld [vmem:[%s1298_s1 + $0x1e8] sm:$0xff]  ;;  %v290_v60 = vld [vmem:[%s1298_s1 + $0x218] sm:$0xff]  ;;  %v767_v63 = vpack.c.bf16 %v277_v55, %v271_v54 }
  0x13   : > { %794 = vmatprep.subr.bf16.mxu1 %v793_v44  ;;  %v286_v61 = vld [vmem:[%s1298_s1 + $0x1f8] sm:$0xff]  ;;  %v292_v62 = vld [vmem:[%s1298_s1 + $0x228] sm:$0xff]  ;;  %v799_v0 = vpack.c.bf16 %v279_v58, %v273_v56  ;;  %v769_v1 = vpack.c.bf16 %v290_v60, %v284_v59  ;;  %v283_v2 = vld [vmem:[%s1298_s1 + $0x1e0] sm:$0xff] }
  0x14   : > { %v289_v3 = vld [vmem:[%s1298_s1 + $0x210] sm:$0xff]  ;;  %v801_v5 = vpack.c.bf16 %v292_v62, %v286_v61  ;;  %v291_v6 = vld [vmem:[%s1298_s1 + $0x220] sm:$0xff]  ;;  %v296_v8 = vld [vmem:[%s1298_s1 + $0x248] sm:$0xff] }
  0x15   : > { %764 = vmatpush1.bf16.msra.mxu0 %v763_v49  ;;  %v285_v4 = vld [vmem:[%s1298_s1 + $0x1f0] sm:$0xff]  ;;  %v302_v9 = vld [vmem:[%s1298_s1 + $0x278] sm:$0xff]  ;;  %v304_v11 = vld [vmem:[%s1298_s1 + $0x288] sm:$0xff]  ;;  %v771_v12 = vpack.c.bf16 %v289_v3, %v283_v2 }
  0x16   : > { %796 = vmatpush1.bf16.msra.mxu1 %v795_v52  ;;  %766 = vmatprep.subr.bf16.mxu0 %v765_v53  ;;  %v298_v10 = vld [vmem:[%s1298_s1 + $0x258] sm:$0xff]  ;;  %v803_v13 = vpack.c.bf16 %v291_v6, %v285_v4  ;;  %v773_v14 = vpack.c.bf16 %v302_v9, %v296_v8  ;;  %v295_v15 = vld [vmem:[%s1298_s1 + $0x240] sm:$0xff]  ;;  %v301_v16 = vld [vmem:[%s1298_s1 + $0x270] sm:$0xff] }
  0x17   : > { %798 = vmatprep.subr.bf16.mxu1 %v797_v57  ;;  %v297_v17 = vld [vmem:[%s1298_s1 + $0x250] sm:$0xff]  ;;  %v805_v18 = vpack.c.bf16 %v304_v11, %v298_v10  ;;  %v303_v19 = vld [vmem:[%s1298_s1 + $0x280] sm:$0xff]  ;;  %v308_v20 = vld [vmem:[%s1298_s1 + $0x2a8] sm:$0xff]  ;;  %v775_v24 = vpack.c.bf16 %v301_v16, %v295_v15 }
  0x18   : > { %v314_v21 = vld [vmem:[%s1298_s1 + $0x2d8] sm:$0xff]  ;;  %v316_v23 = vld [vmem:[%s1298_s1 + $0x2e8] sm:$0xff]  ;;  %v807_v25 = vpack.c.bf16 %v303_v19, %v297_v17  ;;  %v307_v27 = vld [vmem:[%s1298_s1 + $0x2a0] sm:$0xff] }
  0x19   : > { %768 = vmatpush1.bf16.msra.mxu0 %v767_v63  ;;  %v310_v22 = vld [vmem:[%s1298_s1 + $0x2b8] sm:$0xff]  ;;  %v777_v26 = vpack.c.bf16 %v314_v21, %v308_v20  ;;  %v313_v28 = vld [vmem:[%s1298_s1 + $0x2d0] sm:$0xff]  ;;  %v315_v31 = vld [vmem:[%s1298_s1 + $0x2e0] sm:$0xff] }
  0x1a   : > { %800 = vmatpush1.bf16.msra.mxu1 %v799_v0  ;;  %770 = vmatprep.subr.bf16.mxu0 %v769_v1  ;;  %v309_v29 = vld [vmem:[%s1298_s1 + $0x2b0] sm:$0xff]  ;;  %v809_v30 = vpack.c.bf16 %v316_v23, %v310_v22  ;;  %v228_v32 = vld [vmem:[%s1298_s1 + $0x28] sm:$0xff]  ;;  %v234_v33 = vld [vmem:[%s1298_s1 + $0x58] sm:$0xff]  ;;  %v779_v34 = vpack.c.bf16 %v313_v28, %v307_v27  ;;  %v321_v23 = vlaneseq }
  0x1b   : > { %802 = vmatprep.subr.bf16.mxu1 %v801_v5  ;;  %v811_v35 = vpack.c.bf16 %v315_v31, %v309_v29  ;;  %v813_v36 = vpack.c.bf16 %v234_v33, %v228_v32  ;;  %v227_v37 = vld [vmem:[%s1298_s1 + $0x20] sm:$0xff]  ;;  %v233_v38 = vld [vmem:[%s1298_s1 + $0x50] sm:$0xff]  ;;  %v240_v39 = vld [vmem:[%s1298_s1 + $0x88] sm:$0xff] }
  0x1c   : > { %v246_v40 = vld [vmem:[%s1298_s1 + $0xb8] sm:$0xff]  ;;  %v1142_v41 = vld [vmem:[%s1127_s6] sm:$0xff]  ;;  %v815_v42 = vpack.c.bf16 %v233_v38, %v227_v37  ;;  %v245_v45 = vld [vmem:[%s1298_s1 + $0xb0] sm:$0xff] }
  0x1d   : > { %772 = vmatpush1.bf16.msra.mxu0 %v771_v12  ;;  %v817_v43 = vpack.c.bf16 %v246_v40, %v240_v39  ;;  %v239_v44 = vld [vmem:[%s1298_s1 + $0x80] sm:$0xff]  ;;  %v252_v46 = vld [vmem:[%s1298_s1 + $0xe8] sm:$0xff]  ;;  %v258_v47 = vld [vmem:[%s1298_s1 + $0x118] sm:$0xff] }
  0x1e   : > { %804 = vmatpush1.bf16.msra.mxu1 %v803_v13  ;;  %774 = vmatprep.subr.bf16.mxu0 %v773_v14  ;;  %v819_v48 = vpack.c.bf16 %v245_v45, %v239_v44  ;;  %v1159_v49 = vld [vmem:[%s1127_s6 + $0x8] sm:$0xff]  ;;  %v821_v50 = vpack.c.bf16 %v258_v47, %v252_v46  ;;  %v251_v51 = vld [vmem:[%s1298_s1 + $0xe0] sm:$0xff]  ;;  %v257_v52 = vld [vmem:[%s1298_s1 + $0x110] sm:$0xff] }
  0x1f   : > { %806 = vmatprep.subr.bf16.mxu1 %v805_v18  ;;  %v264_v53 = vld [vmem:[%s1298_s1 + $0x148] sm:$0xff]  ;;  %v270_v54 = vld [vmem:[%s1298_s1 + $0x178] sm:$0xff]  ;;  %v823_v55 = vpack.c.bf16 %v257_v52, %v251_v51  ;;  %v1178_v56 = vld [vmem:[%s1127_s6 + $0x10] sm:$0xff] }
  0x20   : > { %v825_v57 = vpack.c.bf16 %v270_v54, %v264_v53  ;;  %v263_v58 = vld [vmem:[%s1298_s1 + $0x140] sm:$0xff]  ;;  %v269_v59 = vld [vmem:[%s1298_s1 + $0x170] sm:$0xff]  ;;  %v276_v60 = vld [vmem:[%s1298_s1 + $0x1a8] sm:$0xff] }
  0x21   : > { %776 = vmatpush1.bf16.msra.mxu0 %v775_v24  ;;  %v282_v61 = vld [vmem:[%s1298_s1 + $0x1d8] sm:$0xff]  ;;  %v827_v62 = vpack.c.bf16 %v269_v59, %v263_v58  ;;  %v275_v1 = vld [vmem:[%s1298_s1 + $0x1a0] sm:$0xff]  ;;  %v281_v2 = vld [vmem:[%s1298_s1 + $0x1d0] sm:$0xff]  ;;  %v1248_v24 = vshrl.u32 %v321_v23, 7 }
  0x22   : > { %808 = vmatpush1.bf16.msra.mxu1 %v807_v25  ;;  %778 = vmatprep.subr.bf16.mxu0 %v777_v26  ;;  %v222_v63 = vld [vmem:[%s1127_s6 + $0x18] sm:$0xff]  ;;  %v829_v0 = vpack.c.bf16 %v282_v61, %v276_v60  ;;  %v288_v3 = vld [vmem:[%s1298_s1 + $0x208] sm:$0xff]  ;;  %v831_v5 = vpack.c.bf16 %v281_v2, %v275_v1  ;;  %v287_v8 = vld [vmem:[%s1298_s1 + $0x200] sm:$0xff] }
  0x23   : > { %810 = vmatprep.subr.bf16.mxu1 %v809_v30  ;;  %v294_v4 = vld [vmem:[%s1298_s1 + $0x238] sm:$0xff]  ;;  %v293_v9 = vld [vmem:[%s1298_s1 + $0x230] sm:$0xff]  ;;  %v300_v10 = vld [vmem:[%s1298_s1 + $0x268] sm:$0xff]  ;;  %v323_v25 = vsub.s32 0, %v1248_v24  ;;  %v327_v27 = vsub.s32 1, %v1248_v24  ;;  %v331_v28 = vsub.s32 2, %v1248_v24 }
  0x24   : > { %v833_v6 = vpack.c.bf16 %v294_v4, %v288_v3  ;;  %v306_v11 = vld [vmem:[%s1298_s1 + $0x298] sm:$0xff]  ;;  %v835_v12 = vpack.c.bf16 %v293_v9, %v287_v8  ;;  %v299_v14 = vld [vmem:[%s1298_s1 + $0x260] sm:$0xff]  ;;  %v305_v15 = vld [vmem:[%s1298_s1 + $0x290] sm:$0xff]  ;;  %v335_v29 = vsub.s32 3, %v1248_v24  ;;  %v339_v1 = vsub.s32 4, %v1248_v24 }
  0x25   : > { %780 = vmatpush1.bf16.msra.mxu0 %v779_v34  ;;  %v837_v13 = vpack.c.bf16 %v306_v11, %v300_v10  ;;  %v312_v16 = vld [vmem:[%s1298_s1 + $0x2c8] sm:$0xff]  ;;  %v318_v17 = vld [vmem:[%s1298_s1 + $0x2f8] sm:$0xff]  ;;  %v839_v18 = vpack.c.bf16 %v305_v15, %v299_v14  ;;  %v311_v20 = vld [vmem:[%s1298_s1 + $0x2c0] sm:$0xff]  ;;  %v343_v2 = vsub.s32 5, %v1248_v24 }
  0x26   : > { %812 = vmatpush1.bf16.msra.mxu1 %v811_v35  ;;  %814 = vmatprep.subr.bf16.mxu0 %v813_v36  ;;  %v841_v19 = vpack.c.bf16 %v318_v17, %v312_v16  ;;  %v317_v21 = vld [vmem:[%s1298_s1 + $0x2f0] sm:$0xff]  ;;  %v319_v26 = vld [vmem:[%s1299_s2] sm:$0x3f] }
  0x27   : > { %845 = vmatprep.subr.bf16.mxu1 %v813_v36  ;;  %v843_v22 = vpack.c.bf16 %v317_v21, %v311_v20  ;;  %v328_v30 = vrot.slane %v319_v26, %v327_v27  ;;  %v332_v31 = vrot.slane %v319_v26, %v331_v28  ;;  %v336_v32 = vrot.slane %v319_v26, %v335_v29 }
  0x28   : > { %416 = vmatmul.mubr.f32.vlgmr.msra.gmra.mrb[0].mxu0 %v1142_v41  ;;  %v340_v3 = vrot.slane %v319_v26, %v339_v1  ;;  %v344_v4 = vrot.slane %v319_v26, %v343_v2 }
  0x29   : > { %816 = vmatpush1.bf16.msra.mxu0 %v815_v42  ;;  %505 = vmatmul.mubr.f32.vlgmr.msra.gmra.mrb[0].mxu1 %v1142_v41 }
  0x2a   : > { %853 = vmatpush1.bf16.msra.mxu1 %v815_v42  ;;  %818 = vmatprep.subr.bf16.mxu0 %v817_v43 }
  0x2b   : > { %846 = vmatprep.subr.bf16.mxu1 %v817_v43  ;;  %421 = vmatprep.mubr.f32.mxu0 %v879_v7 }
  0x2c   : > { %422 = vmatmul.mubr.f32.gmra.mrb[2].mxu0 %v1159_v49  ;;  %510 = vmatprep.mubr.f32.mxu1 %v879_v7 }
  0x2d   : > { %820 = vmatpush1.bf16.msra.mxu0 %v819_v48  ;;  %511 = vmatmul.mubr.f32.gmra.mrb[2].mxu1 %v1159_v49 }
  0x2e   : > { %854 = vmatpush1.bf16.msra.mxu1 %v819_v48  ;;  %822 = vmatprep.subr.bf16.mxu0 %v821_v50 }
  0x2f   : > { %847 = vmatprep.subr.bf16.mxu1 %v821_v50  ;;  %427 = vmatprep.mubr.f32.mxu0 %v879_v7 }
  0x30   : > { %428 = vmatmul.mubr.f32.gmra.mrb[4].mxu0 %v1178_v56  ;;  %516 = vmatprep.mubr.f32.mxu1 %v879_v7 }
  0x31   : > { %824 = vmatpush1.bf16.msra.mxu0 %v823_v55  ;;  %517 = vmatmul.mubr.f32.gmra.mrb[4].mxu1 %v1178_v56 }
  0x32   : > { %855 = vmatpush1.bf16.msra.mxu1 %v823_v55  ;;  %826 = vmatprep.subr.bf16.mxu0 %v825_v57 }
  0x33   : > { %848 = vmatprep.subr.bf16.mxu1 %v825_v57  ;;  %433 = vmatprep.mubr.f32.mxu0 %v879_v7 }
  0x34   : > { %434 = vmatmul.mubr.f32.gmra.mrb[6].mxu0 %v222_v63  ;;  %522 = vmatprep.mubr.f32.mxu1 %v879_v7 }
  0x35   : > { %828 = vmatpush1.bf16.msra.mxu0 %v827_v62  ;;  %523 = vmatmul.mubr.f32.gmra.mrb[6].mxu1 %v222_v63 }
  0x36   : > { %856 = vmatpush1.bf16.msra.mxu1 %v827_v62  ;;  %830 = vmatprep.subr.bf16.mxu0 %v829_v0 }
  0x37   : > { %849 = vmatprep.subr.bf16.mxu1 %v829_v0  ;;  %593 = vmatprep.mubr.f32.mxu0 %v879_v7 }
  0x38   : > { %605 = vmatprep.mubr.f32.mxu1 %v879_v7 }
  0x39   : > { %832 = vmatpush1.bf16.msra.mxu0 %v831_v5 }
  0x3a   : > { %857 = vmatpush1.bf16.msra.mxu1 %v831_v5  ;;  %834 = vmatprep.subr.bf16.mxu0 %v833_v6 }
  0x3b   : > { %850 = vmatprep.subr.bf16.mxu1 %v833_v6 }
  0x3d   : > { %836 = vmatpush1.bf16.msra.mxu0 %v835_v12 }
  0x3e   : > { %858 = vmatpush1.bf16.msra.mxu1 %v835_v12  ;;  %838 = vmatprep.subr.bf16.mxu0 %v837_v13 }
  0x3f   : > { %851 = vmatprep.subr.bf16.mxu1 %v837_v13 }
  0x41   : > { %840 = vmatpush1.bf16.msra.mxu0 %v839_v18 }
  0x42   : > { %859 = vmatpush1.bf16.msra.mxu1 %v839_v18  ;;  %842 = vmatprep.subr.bf16.mxu0 %v841_v19 }
  0x43   : > { %852 = vmatprep.subr.bf16.mxu1 %v841_v19 }
  0x45   : > { %844 = vmatpush1.bf16.msra.mxu0 %v843_v22 }
  0x46   : > { %860 = vmatpush1.bf16.msra.mxu1 %v843_v22 }
  0x48   : > { %594 = vmatmul.mubr.f32.vlgmr.msra.gmra.mrb[8].mxu0 %v1142_v41 }
  0x49   : > { %606 = vmatmul.mubr.f32.vlgmr.msra.gmra.mrb[8].mxu1 %v1178_v56  ;;  %599 = vmatprep.mubr.f32.mxu0 %v879_v7 }
  0x4a   : > { %611 = vmatprep.mubr.f32.mxu1 %v879_v7  ;;  %v324_v7 = vrot.slane %v319_v26, %v323_v25 }
  0x4c   : > { %600 = vmatmul.mubr.f32.gmra.mrb[10].mxu0 %v1159_v49 }
  0x4d   : > { %612 = vmatmul.mubr.f32.gmra.mrb[10].mxu1 %v222_v63 }
  0xfb   : > { %v417_v33 = vpop.f32.mrb[0].mxu0 }
  0xfc   : > { %v418_v34 = vadd.f32 %v417_v33, %v324_v7  ;;  %v419_v35 = vpop.f32.mrb[1].mxu0  ;;  %v506_v36 = vpop.f32.mrb[0].mxu1 }
  0xfd   : > { %v420_v37 = vadd.f32 %v419_v35, %v328_v30  ;;  %v507_v38 = vadd.f32 %v506_v36, %v332_v31  ;;  %v508_v39 = vpop.f32.mrb[1].mxu1 }
  0xfe   : > { %618 = vst [vmem:[%s1261_s26] sm:$0xff] %v418_v34  ;;  %v509_v40 = vadd.f32 %v508_v39, %v336_v32 }
  0xff   : > { %619 = vst [vmem:[%s1261_s26 + $0x8] sm:$0xff] %v420_v37  ;;  %620 = vst [vmem:[%s1261_s26 + $0x10] sm:$0xff] %v507_v38  ;;  %v423_v41 = vpop.f32.mrb[2].mxu0 }
 0x100   : > { %630 = vst [vmem:[%s1266_s7] sm:$0xff] %v509_v40  ;;  %v424_v42 = vadd.f32 %v423_v41, %v324_v7  ;;  %v425_v43 = vpop.f32.mrb[3].mxu0  ;;  %v512_v44 = vpop.f32.mrb[2].mxu1 }
 0x101   : > { %v426_v45 = vadd.f32 %v425_v43, %v328_v30  ;;  %v513_v46 = vadd.f32 %v512_v44, %v332_v31  ;;  %v514_v47 = vpop.f32.mrb[3].mxu1 }
 0x102   : > { %621 = vst [vmem:[%s1261_s26 + $0x18] sm:$0xff] %v424_v42  ;;  %v515_v48 = vadd.f32 %v514_v47, %v336_v32 }
 0x103   : > { %622 = vst [vmem:[%s1261_s26 + $0x20] sm:$0xff] %v426_v45  ;;  %623 = vst [vmem:[%s1261_s26 + $0x28] sm:$0xff] %v513_v46  ;;  %v429_v49 = vpop.f32.mrb[4].mxu0 }
 0x104   : > { %633 = vst [vmem:[%s1266_s7 + $0x18] sm:$0xff] %v515_v48  ;;  %v430_v50 = vadd.f32 %v429_v49, %v324_v7  ;;  %v431_v51 = vpop.f32.mrb[5].mxu0  ;;  %v518_v52 = vpop.f32.mrb[4].mxu1 }
 0x105   : > { %v432_v53 = vadd.f32 %v431_v51, %v328_v30  ;;  %v519_v54 = vadd.f32 %v518_v52, %v332_v31  ;;  %v520_v55 = vpop.f32.mrb[5].mxu1 }
 0x106   : > { %624 = vst [vmem:[%s1261_s26 + $0x30] sm:$0xff] %v430_v50  ;;  %v521_v56 = vadd.f32 %v520_v55, %v336_v32 }
 0x107   : > { %625 = vst [vmem:[%s1261_s26 + $0x38] sm:$0xff] %v432_v53  ;;  %626 = vst [vmem:[%s1261_s26 + $0x40] sm:$0xff] %v519_v54  ;;  %v435_v57 = vpop.f32.mrb[6].mxu0 }
 0x108   : > { %636 = vst [vmem:[%s1266_s7 + $0x30] sm:$0xff] %v521_v56  ;;  %v436_v58 = vadd.f32 %v435_v57, %v324_v7  ;;  %v437_v59 = vpop.f32.mrb[7].mxu0  ;;  %v524_v60 = vpop.f32.mrb[6].mxu1 }
 0x109   : > { %v438_v61 = vadd.f32 %v437_v59, %v328_v30  ;;  %v525_v62 = vadd.f32 %v524_v60, %v332_v31  ;;  %v526_v63 = vpop.f32.mrb[7].mxu1 }
 0x10a   : > { %627 = vst [vmem:[%s1261_s26 + $0x48] sm:$0xff] %v436_v58  ;;  %v527_v0 = vadd.f32 %v526_v63, %v336_v32 }
 0x10b   : > { %628 = vst [vmem:[%s1261_s26 + $0x50] sm:$0xff] %v438_v61  ;;  %629 = vst [vmem:[%s1261_s26 + $0x58] sm:$0xff] %v525_v62 }
 0x10c   : > { %639 = vst [vmem:[%s1266_s7 + $0x48] sm:$0xff] %v527_v0 }
 0x11b   : > { %v595_v5 = vpop.f32.mrb[8].mxu0 }
 0x11c   : > { %v596_v6 = vadd.f32 %v595_v5, %v340_v3  ;;  %v597_v8 = vpop.f32.mrb[9].mxu0  ;;  %v607_v9 = vpop.f32.mrb[8].mxu1 }
 0x11d   : > { %v598_v10 = vadd.f32 %v597_v8, %v344_v4  ;;  %v609_v11 = vpop.f32.mrb[9].mxu1  ;;  %v608_v16 = vadd.f32 %v607_v9, %v340_v3 }
 0x11e   : > { %631 = vst [vmem:[%s1266_s7 + $0x8] sm:$0xff] %v596_v6  ;;  %v610_v20 = vadd.f32 %v609_v11, %v344_v4 }
 0x11f   : > { %632 = vst [vmem:[%s1266_s7 + $0x10] sm:$0xff] %v598_v10  ;;  %v601_v12 = vpop.f32.mrb[10].mxu0  ;;  %637 = vst [vmem:[%s1266_s7 + $0x38] sm:$0xff] %v608_v16 }
 0x120   : > { %v602_v13 = vadd.f32 %v601_v12, %v340_v3  ;;  %v603_v14 = vpop.f32.mrb[11].mxu0  ;;  %v613_v15 = vpop.f32.mrb[10].mxu1  ;;  %638 = vst [vmem:[%s1266_s7 + $0x40] sm:$0xff] %v610_v20 }
 0x121   : > { %v604_v17 = vadd.f32 %v603_v14, %v344_v4  ;;  %v614_v18 = vadd.f32 %v613_v15, %v340_v3  ;;  %v615_v19 = vpop.f32.mrb[11].mxu1 }
 0x122   : > { %634 = vst [vmem:[%s1266_s7 + $0x20] sm:$0xff] %v602_v13  ;;  %v616_v21 = vadd.f32 %v615_v19, %v344_v4 }
 0x123   : > { %635 = vst [vmem:[%s1266_s7 + $0x28] sm:$0xff] %v604_v17  ;;  %640 = vst [vmem:[%s1266_s7 + $0x50] sm:$0xff] %v614_v18 }
 0x124   : > { %641 = vst [vmem:[%s1266_s7 + $0x58] sm:$0xff] %v616_v21 }
 0x125 PF: > { %s15_s15 = sadd.s32 1, %s877_s15  }
 0x126   : > { %p12_p4 = scmp.ge.s32.totalorder %s15_s15, 4  }
 0x128   :  { %14 = sbr.rel (!%p12_p4) target bundleno = 1 (0x1), region = 74 }

// kernel: encoder_rnn_forward.3
= control target key start
LH: loop header
LB: loop body
LE: loop exit
PB: predicated region body
PF: predicated region fallthrough
CT: control target
= control target key end

     0   :  { %s3169_s13 = smov 0   ;;  %s4007_s0 = inlined_call_operand.vmem [shape: s32[8,1], index: 0, kind: input, shape index: {}]   ;;  %s4008_s1 = inlined_call_operand.vmem [shape: f32[8,8,384], index: 1, kind: input, shape index: {}]   ;;  %s4009_s2 = inlined_call_operand.vmem [shape: f32[8,8,384], index: 2, kind: input, shape index: {}]   ;;  %s4010_s3 = inlined_call_operand.vmem [shape: f32[128,384], index: 3, kind: input, shape index: {}]   ;;  %s4011_s4 = inlined_call_operand.vmem [shape: f32[1,128], index: 4, kind: input, shape index: {}]   ;;  %s4012_s5 = inlined_call_operand.vmem [shape: f32[128,384], index: 5, kind: input, shape index: {}]   ;;  %s4013_s6 = inlined_call_operand.vmem [shape: f32[1,128], index: 6, kind: input, shape index: {}]   ;;  %s4014_s7 = inlined_call_operand.vmem [shape: f32[8,8,128], index: 7, kind: output, shape index: {0}]   ;;  %s4015_s8 = inlined_call_operand.vmem [shape: f32[8,8,128], index: 8, kind: output, shape index: {1}]   ;;  %s4016_s9 = inlined_call_operand.vmem [shape: f32[8,128], index: 9, kind: output, shape index: {2}]   ;;  %s4017_s10 = inlined_call_operand.vmem [shape: f32[8,128], index: 10, kind: output, shape index: {3}]  }
   0x1 LB: > { %4038 = sst [smem:[#allocation4_spill]] %s3107_s13  ;;  %s2080_s14 = sadd.s32 4294967295, %s3107_s13   ;;  %s3107_s13 = sphi %s3169_s13, %s21_s13  }
   0x2   : > { %p2084_p0 = scmp.ge.s32.totalorder %s3107_s13, 1  ;;  %p329_p1 = scmp.lt.s32.totalorder %s3107_s13, 3 }
   0x4   : > { %p330_p2 = pnand %p2084_p0, %p329_p1 }
   0x6   : > { %333 = sbr.rel (%p330_p2) target bundleno = 1138 (0x472), region = 48 }
   0xd   : > { %s3177_s15 = sshll.u32 %s2080_s14, 2  ;;  %s388_s16 = ssub.s32 1, %s2080_s14 }
   0xe   : > { %p382_p3 = scmp.lt.s32.totalorder %s3177_s15, 7  ;;  %s3180_s17 = sshll.u32 %s388_s16, 2 }
   0xf   : > { %p390_p4 = scmp.lt.s32.totalorder %s3180_s17, 7  ;;  %p2093_p5 = scmp.ne.s32.totalorder %s2080_s14, 0 }
  0x10   : > { %s383_s18 = scalar_select %p382_p3, %s3177_s15, 7 }
  0x11   : > { %s391_s19 = scalar_select %p390_p4, %s3180_s17, 7 }
  0x12   : > { %s3004_s20 = smul.u32 24, %s383_s18  ;;  %s2090_s21 = sshll.u32 %s383_s18, 3  ;;  %v3109_v0 = vmov (!%p2093_p5), 0.0  }
  0x13   : > { %s3005_s22 = smul.u32 24, %s391_s19  ;;  %s3188_s25 = scalar_lea.vmem %s4014_s7, %s2090_s21  ;;  %415 = vst [vmem:[#allocation2] sm:$0xff] (!%p2093_p5), %v3109_v0  ;;  %416 = vst [vmem:[#allocation3] sm:$0xff] (!%p2093_p5), %v3109_v0 }
  0x14   : > { %s3193_s28 = scalar_lea.vmem %s4008_s1, %s3004_s20  ;;  %s2092_s29 = sshll.u32 %s391_s19, 3 }
  0x15   : > { %s3198_s12 = scalar_lea.vmem %s4009_s2, %s3005_s22  ;;  %s3203_s18 = scalar_lea.vmem %s4015_s8, %s2092_s29 }
  0x16   : > { %414 = sbr.rel (%p2093_p5) target bundleno = 29 (0x1d), region = 52 }
  0x1d PF: > { %v419_v1 = vld [vmem:[%s4010_s3 + $0x8] sm:$0xff]  ;;  %v422_v2 = vld [vmem:[%s4010_s3 + $0x20] sm:$0xff]  ;;  %v421_v5 = vld [vmem:[%s4010_s3 + $0x18] sm:$0xff]  ;;  %v4021_v8 = vmov 0.0|0.0   ;;  %v4019_v9 = vmov 0.0   ;;  %vm3112_vm0 = vmmov 0  }
  0x1e   : > { %v418_v3 = vld [vmem:[%s4010_s3] sm:$0xff]  ;;  %v3214_v4 = vpack.c.bf16 %v422_v2, %v419_v1  ;;  %v425_v6 = vld [vmem:[%s4010_s3 + $0x38] sm:$0xff]  ;;  %v428_v7 = vld [vmem:[%s4010_s3 + $0x50] sm:$0xff]  ;;  %2588 = vmatprep.subr.bf16.mxu1 %v4021_v8  ;;  %588 = vmatprep.mubr.f32.mxu0 %v4019_v9  ;;  %v3113_v15 = vmov 0   ;;  %s876_s26 = sadd.s32 3, %s3180_s17  ;;  %s1413_s14 = sadd.s32 2, %s3177_s15 }
  0x1f   : > { %v3227_v10 = vpack.c.bf16 %v421_v5, %v418_v3  ;;  %v3229_v11 = vpack.c.bf16 %v428_v7, %v425_v6  ;;  %v424_v12 = vld [vmem:[%s4010_s3 + $0x30] sm:$0xff]  ;;  %v427_v13 = vld [vmem:[%s4010_s3 + $0x48] sm:$0xff]  ;;  %2308 = vmatprep.mubr.msk.f32.mxu1 %vm3112_vm0, %v4019_v9  ;;  %3019 = vset.pattern.permute.xlu0 %v3113_v15  ;;  %v434_v16 = vld [vmem:[%s4010_s3 + $0x80] sm:$0xff]  ;;  %s1771_s29 = sadd.s32 3, %s3177_s15  ;;  %s1055_s20 = sadd.s32 1, %s3177_s15 }
  0x20   : > { %v431_v14 = vld [vmem:[%s4010_s3 + $0x68] sm:$0xff]  ;;  %2557 = vmatprep.subr.bf16.mxu0 %v3214_v4  ;;  %3020 = vset.pattern.permute.xlu1 %v3113_v15  ;;  %v3249_v17 = vpack.c.bf16 %v427_v13, %v424_v12  ;;  %v430_v19 = vld [vmem:[%s4010_s3 + $0x60] sm:$0xff]  ;;  %v433_v20 = vld [vmem:[%s4010_s3 + $0x78] sm:$0xff]  ;;  %s1234_s19 = sadd.s32 2, %s3180_s17  ;;  %s1592_s23 = sadd.s32 1, %s3180_s17 }
  0x21   : > { %2559 = vmatpush1.bf16.msra.mxu0 %v3227_v10  ;;  %v3252_v18 = vpack.c.bf16 %v434_v16, %v431_v14  ;;  %v437_v21 = vld [vmem:[%s4010_s3 + $0x98] sm:$0xff]  ;;  %v440_v22 = vld [vmem:[%s4010_s3 + $0xb0] sm:$0xff]  ;;  %v3267_v23 = vpack.c.bf16 %v433_v20, %v430_v19  ;;  %v439_v26 = vld [vmem:[%s4010_s3 + $0xa8] sm:$0xff] }
  0x22   : > { %2561 = vmatprep.subr.bf16.mxu0 %v3229_v11  ;;  %v436_v24 = vld [vmem:[%s4010_s3 + $0x90] sm:$0xff]  ;;  %v3273_v25 = vpack.c.bf16 %v440_v22, %v437_v21  ;;  %v423_v28 = vld [vmem:[%s4010_s3 + $0x28] sm:$0xff]  ;;  %v446_v30 = vld [vmem:[%s4010_s3 + $0xe0] sm:$0xff] }
  0x23   : > { %v420_v27 = vld [vmem:[%s4010_s3 + $0x10] sm:$0xff]  ;;  %v443_v29 = vld [vmem:[%s4010_s3 + $0xc8] sm:$0xff]  ;;  %v426_v32 = vld [vmem:[%s4010_s3 + $0x40] sm:$0xff]  ;;  %v3299_v34 = vpack.c.bf16 %v439_v26, %v436_v24  ;;  %v693_v24 = vstv %s3177_s15 }
  0x24   : > { %v3290_v31 = vpack.c.bf16 %v423_v28, %v420_v27  ;;  %v429_v33 = vld [vmem:[%s4010_s3 + $0x58] sm:$0xff]  ;;  %v3305_v36 = vpack.c.bf16 %v446_v30, %v443_v29  ;;  %v442_v37 = vld [vmem:[%s4010_s3 + $0xc0] sm:$0xff]  ;;  %v432_v39 = vld [vmem:[%s4010_s3 + $0x70] sm:$0xff]  ;;  %v877_v26 = vstv %s876_s26 }
  0x25   : > { %2563 = vmatpush1.bf16.msra.mxu0 %v3249_v17  ;;  %v3302_v35 = vpack.c.bf16 %v429_v33, %v426_v32  ;;  %v445_v38 = vld [vmem:[%s4010_s3 + $0xd8] sm:$0xff]  ;;  %v452_v41 = vld [vmem:[%s4010_s3 + $0x110] sm:$0xff]  ;;  %v435_v42 = vld [vmem:[%s4010_s3 + $0x88] sm:$0xff] }
  0x26   : > { %2565 = vmatprep.subr.bf16.mxu0 %v3252_v18  ;;  %2590 = vmatpush3.bf16.msra.mxu1 %v3290_v31  ;;  %v449_v40 = vld [vmem:[%s4010_s3 + $0xf8] sm:$0xff]  ;;  %v3327_v43 = vpack.c.bf16 %v445_v38, %v442_v37  ;;  %v448_v44 = vld [vmem:[%s4010_s3 + $0xf0] sm:$0xff]  ;;  %v3333_v45 = vpack.c.bf16 %v435_v42, %v432_v39  ;;  %v451_v47 = vld [vmem:[%s4010_s3 + $0x108] sm:$0xff] }
  0x27   : > { %2591 = vmatprep.subr.bf16.mxu1 %v4021_v8  ;;  %v3336_v46 = vpack.c.bf16 %v452_v41, %v449_v40  ;;  %v438_v48 = vld [vmem:[%s4010_s3 + $0xa0] sm:$0xff]  ;;  %v441_v49 = vld [vmem:[%s4010_s3 + $0xb8] sm:$0xff]  ;;  %v455_v50 = vld [vmem:[%s4010_s3 + $0x128] sm:$0xff]  ;;  %v3355_v52 = vpack.c.bf16 %v451_v47, %v448_v44  ;;  %v1414_v44 = vstv %s1413_s14 }
  0x28   : > { %v458_v51 = vld [vmem:[%s4010_s3 + $0x140] sm:$0xff]  ;;  %v3361_v54 = vpack.c.bf16 %v441_v49, %v438_v48  ;;  %v457_v56 = vld [vmem:[%s4010_s3 + $0x138] sm:$0xff]  ;;  %v444_v57 = vld [vmem:[%s4010_s3 + $0xd0] sm:$0xff] }
  0x29   : > { %2567 = vmatpush1.bf16.msra.mxu0 %v3267_v23  ;;  %v454_v53 = vld [vmem:[%s4010_s3 + $0x120] sm:$0xff]  ;;  %v3364_v55 = vpack.c.bf16 %v458_v51, %v455_v50  ;;  %v447_v58 = vld [vmem:[%s4010_s3 + $0xe8] sm:$0xff]  ;;  %v461_v59 = vld [vmem:[%s4010_s3 + $0x158] sm:$0xff] }
  0x2a   : > { %2569 = vmatprep.subr.bf16.mxu0 %v3273_v25  ;;  %2593 = vmatpush3.bf16.msra.mxu1 %v3302_v35  ;;  %v464_v60 = vld [vmem:[%s4010_s3 + $0x170] sm:$0xff]  ;;  %v3383_v61 = vpack.c.bf16 %v457_v56, %v454_v53  ;;  %v3389_v63 = vpack.c.bf16 %v447_v58, %v444_v57  ;;  %v463_v1 = vld [vmem:[%s4010_s3 + $0x168] sm:$0xff]  ;;  %v450_v2 = vld [vmem:[%s4010_s3 + $0x100] sm:$0xff] }
  0x2b   : > { %2594 = vmatprep.subr.bf16.mxu1 %v4021_v8  ;;  %4039 = vst [vmem:[#allocation5_spill] sm:$0xff] %v3364_v55  ;;  %v460_v62 = vld [vmem:[%s4010_s3 + $0x150] sm:$0xff]  ;;  %v3392_v0 = vpack.c.bf16 %v464_v60, %v461_v59  ;;  %v453_v3 = vld [vmem:[%s4010_s3 + $0x118] sm:$0xff]  ;;  %v467_v5 = vld [vmem:[%s4012_s5 + $0x8] sm:$0xff]  ;;  %v1772_v60 = vstv %s1771_s29 }
  0x2c   : > { %4040 = vst [vmem:[#allocation6_spill] sm:$0xff] %v3383_v61  ;;  %v470_v6 = vld [vmem:[%s4012_s5 + $0x20] sm:$0xff]  ;;  %v3412_v7 = vpack.c.bf16 %v463_v1, %v460_v62  ;;  %v3418_v13 = vpack.c.bf16 %v453_v3, %v450_v2  ;;  %v469_v16 = vld [vmem:[%s4012_s5 + $0x18] sm:$0xff]  ;;  %v456_v19 = vld [vmem:[%s4010_s3 + $0x130] sm:$0xff] }
  0x2d   : > { %2571 = vmatpush1.bf16.msra.mxu0 %v3299_v34  ;;  %4041 = vst [vmem:[#allocation7_spill] sm:$0xff] %v3392_v0  ;;  %v466_v12 = vld [vmem:[%s4012_s5] sm:$0xff]  ;;  %v3421_v14 = vpack.c.bf16 %v470_v6, %v467_v5  ;;  %v459_v20 = vld [vmem:[%s4010_s3 + $0x148] sm:$0xff]  ;;  %v473_v21 = vld [vmem:[%s4012_s5 + $0x38] sm:$0xff] }
  0x2e   : > { %2573 = vmatprep.subr.bf16.mxu0 %v3305_v36  ;;  %2596 = vmatpush3.bf16.msra.mxu1 %v3333_v45  ;;  %4042 = vst [vmem:[#allocation8_spill] sm:$0xff] %v3412_v7  ;;  %4043 = vst [vmem:[#allocation9_spill] sm:$0xff] %v3418_v13  ;;  %v476_v22 = vld [vmem:[%s4012_s5 + $0x50] sm:$0xff]  ;;  %v3442_v27 = vld [vmem:[#allocation2] sm:$0xff]  ;;  %v3444_v28 = vpack.c.bf16 %v469_v16, %v466_v12  ;;  %v3450_v30 = vpack.c.bf16 %v459_v20, %v456_v19 }
  0x2f   : > { %2597 = vmatprep.subr.bf16.mxu1 %v4021_v8  ;;  %4044 = vst [vmem:[#allocation10_spill] sm:$0xff] %v3421_v14  ;;  %v472_v29 = vld [vmem:[%s4012_s5 + $0x30] sm:$0xff]  ;;  %v3455_v32 = vld [vmem:[%s4007_s0] sm:$0xff]  ;;  %v3458_v33 = vpack.c.bf16 %v476_v22, %v473_v21  ;;  %v475_v37 = vld [vmem:[%s4012_s5 + $0x48] sm:$0xff] }
  0x30   : > { %4045 = vst [vmem:[#allocation11_spill] sm:$0xff] %v3450_v30  ;;  %v462_v38 = vld [vmem:[%s4010_s3 + $0x160] sm:$0xff]  ;;  %v465_v39 = vld [vmem:[%s4010_s3 + $0x178] sm:$0xff]  ;;  %vm694_vm1 = vcmp.lt.s32.totalorder %v693_v24, %v3455_v32  ;;  %vm878_vm2 = vcmp.lt.s32.totalorder %v877_v26, %v3455_v32  ;;  %v479_v40 = vld [vmem:[%s4012_s5 + $0x68] sm:$0xff]  ;;  %v3482_v47 = vpack.c.bf16 %v475_v37, %v472_v29  ;;  %vm1415_vm3 = vcmp.lt.s32.totalorder %v1414_v44, %v3455_v32 }
  0x31   : > { %2575 = vmatpush1.bf16.msra.mxu0 %v3327_v43  ;;  %v482_v41 = vld [vmem:[%s4012_s5 + $0x80] sm:$0xff]  ;;  %v695_v42 = vsel %vm694_vm1, 1, %v3113_v15  ;;  %v3488_v49 = vpack.c.bf16 %v465_v39, %v462_v38  ;;  %v879_v50 = vsel %vm878_vm2, 1, %v3113_v15  ;;  %v481_v53 = vld [vmem:[%s4012_s5 + $0x78] sm:$0xff]  ;;  %v468_v56 = vld [vmem:[%s4012_s5 + $0x10] sm:$0xff]  ;;  %v1416_v3 = vsel %vm1415_vm3, 1, %v3113_v15 }
  0x32   : > { %2577 = vmatprep.subr.bf16.mxu0 %v3336_v46  ;;  %2599 = vmatpush3.bf16.msra.mxu1 %v3361_v54  ;;  %v478_v48 = vld [vmem:[%s4012_s5 + $0x60] sm:$0xff]  ;;  %v3492_v51 = vpack.c.bf16 %v482_v41, %v479_v40  ;;  %v471_v57 = vld [vmem:[%s4012_s5 + $0x28] sm:$0xff]  ;;  %v485_v58 = vld [vmem:[%s4012_s5 + $0x98] sm:$0xff]  ;;  %vm1773_vm4 = vcmp.lt.s32.totalorder %v1772_v60, %v3455_v32 }
  0x33   : > { %2600 = vmatprep.subr.bf16.mxu1 %v4021_v8  ;;  %697 = vperm.xlu0 %3019, %v695_v42   ;;  %4046 = vst [vmem:[#allocation12_spill] sm:$0xff] %v3488_v49  ;;  %v488_v59 = vld [vmem:[%s4012_s5 + $0xb0] sm:$0xff]  ;;  %v3513_v62 = vpack.c.bf16 %v481_v53, %v478_v48  ;;  %v3519_v2 = vpack.c.bf16 %v471_v57, %v468_v56  ;;  %v487_v6 = vld [vmem:[%s4012_s5 + $0xa8] sm:$0xff]  ;;  %v474_v12 = vld [vmem:[%s4012_s5 + $0x40] sm:$0xff]  ;;  %v1774_v26 = vsel %vm1773_vm4, 1, %v3113_v15 }
  0x34   : > { %v484_v1 = vld [vmem:[%s4012_s5 + $0x90] sm:$0xff]  ;;  %v3523_v5 = vpack.c.bf16 %v488_v59, %v485_v58  ;;  %v477_v16 = vld [vmem:[%s4012_s5 + $0x58] sm:$0xff]  ;;  %v491_v19 = vld [vmem:[%s4012_s5 + $0xc8] sm:$0xff] }
  0x35   : > { %2579 = vmatpush1.bf16.msra.mxu0 %v3355_v52  ;;  %v494_v20 = vld [vmem:[%s4012_s5 + $0xe0] sm:$0xff]  ;;  %v3544_v21 = vpack.c.bf16 %v487_v6, %v484_v1  ;;  %v3550_v24 = vpack.c.bf16 %v477_v16, %v474_v12  ;;  %v493_v37 = vld [vmem:[%s4012_s5 + $0xd8] sm:$0xff]  ;;  %v480_v38 = vld [vmem:[%s4012_s5 + $0x70] sm:$0xff] }
  0x36   : > { %2581 = vmatprep.subr.bf16.mxu0 %v3364_v55  ;;  %2602 = vmatpush3.bf16.msra.mxu1 %v3389_v63  ;;  %v490_v22 = vld [vmem:[%s4012_s5 + $0xc0] sm:$0xff]  ;;  %v3554_v29 = vpack.c.bf16 %v494_v20, %v491_v19  ;;  %v483_v39 = vld [vmem:[%s4012_s5 + $0x88] sm:$0xff]  ;;  %v497_v40 = vld [vmem:[%s4012_s5 + $0xf8] sm:$0xff] }
  0x37   : > { %2603 = vmatprep.subr.bf16.mxu1 %v4021_v8  ;;  %881 = vperm.xlu0 %3019, %v879_v50   ;;  %v500_v41 = vld [vmem:[%s4012_s5 + $0x110] sm:$0xff]  ;;  %v3575_v42 = vpack.c.bf16 %v493_v37, %v490_v22  ;;  %v3581_v48 = vpack.c.bf16 %v483_v39, %v480_v38  ;;  %v499_v53 = vld [vmem:[%s4012_s5 + $0x108] sm:$0xff]  ;;  %v486_v56 = vld [vmem:[%s4012_s5 + $0xa0] sm:$0xff] }
  0x38   : > { %v496_v44 = vld [vmem:[%s4012_s5 + $0xf0] sm:$0xff]  ;;  %v3584_v50 = vpack.c.bf16 %v500_v41, %v497_v40  ;;  %v489_v57 = vld [vmem:[%s4012_s5 + $0xb8] sm:$0xff]  ;;  %v503_v58 = vld [vmem:[%s4012_s5 + $0x128] sm:$0xff] }
  0x39   : > { %2583 = vmatpush1.bf16.msra.mxu0 %v3383_v61  ;;  %v506_v59 = vld [vmem:[%s4012_s5 + $0x140] sm:$0xff]  ;;  %v3603_v60 = vpack.c.bf16 %v499_v53, %v496_v44  ;;  %v505_v12 = vld [vmem:[%s4012_s5 + $0x138] sm:$0xff]  ;;  %v492_v16 = vld [vmem:[%s4012_s5 + $0xd0] sm:$0xff] }
  0x3a   : > { %2585 = vmatprep.subr.bf16.mxu0 %v3392_v0  ;;  %2605 = vmatpush3.bf16.msra.mxu1 %v3418_v13  ;;  %v502_v1 = vld [vmem:[%s4012_s5 + $0x120] sm:$0xff]  ;;  %v3612_v6 = vpack.c.bf16 %v506_v59, %v503_v58  ;;  %v495_v19 = vld [vmem:[%s4012_s5 + $0xe8] sm:$0xff]  ;;  %v509_v20 = vld [vmem:[%s4012_s5 + $0x158] sm:$0xff] }
  0x3b   : > { %2606 = vmatprep.subr.bf16.mxu1 %v4021_v8  ;;  %1418 = vperm.xlu0 %3019, %v1416_v3   ;;  %v3609_v3 = vpack.c.bf16 %v489_v57, %v486_v56  ;;  %v512_v22 = vld [vmem:[%s4012_s5 + $0x170] sm:$0xff]  ;;  %v3637_v38 = vpack.c.bf16 %v495_v19, %v492_v16  ;;  %v511_v40 = vld [vmem:[%s4012_s5 + $0x168] sm:$0xff]  ;;  %v498_v41 = vld [vmem:[%s4012_s5 + $0x100] sm:$0xff] }
  0x3c   : > { %v508_v37 = vld [vmem:[%s4012_s5 + $0x150] sm:$0xff]  ;;  %v3640_v39 = vpack.c.bf16 %v512_v22, %v509_v20  ;;  %v501_v44 = vld [vmem:[%s4012_s5 + $0x118] sm:$0xff]  ;;  %v507_v58 = vld [vmem:[%s4012_s5 + $0x148] sm:$0xff]  ;;  %v1056_v20 = vstv %s1055_s20 }
  0x3d   : > { %2587 = vmatpush1.bf16.msra.mxu0 %v3412_v7  ;;  %v3653_v53 = vpack.c.bf16 %v511_v40, %v508_v37  ;;  %v3656_v56 = vpack.c.bf16 %v501_v44, %v498_v41  ;;  %v504_v57 = vld [vmem:[%s4012_s5 + $0x130] sm:$0xff]  ;;  %v3667_v59 = vld [vmem:[#allocation3] sm:$0xff]  ;;  %v513_v16 = vld [vmem:[%s4012_s5 + $0x178] sm:$0xff]  ;;  %v1235_v22 = vstv %s1234_s19  ;;  %vm1057_vm5 = vcmp.lt.s32.totalorder %v1056_v20, %v3455_v32 }
  0x3e   : > { %2613 = vmatprep.subr.bf16.mxu0 %v3421_v14  ;;  %2608 = vmatpush3.bf16.msra.mxu1 %v3450_v30  ;;  %vm1236_vm6 = vcmp.lt.s32.totalorder %v1235_v22, %v3455_v32  ;;  %v1058_v37 = vsel %vm1057_vm5, 1, %v3113_v15  ;;  %v1593_v40 = vstv %s1592_s23  ;;  %v1949_v44 = vstv %s3180_s17  ;;  %v522_v22 = vld [vmem:[%s3193_s28 + $0x8] sm:$0xff] }
  0x3f   : > { %2609 = vmatprep.subr.bf16.mxu1 %v4021_v8  ;;  %1776 = vperm.xlu0 %3019, %v1774_v26   ;;  %v3631_v26 = vpack.c.bf16 %v505_v12, %v502_v1  ;;  %v3670_v1 = vpack.c.bf16 %v507_v58, %v504_v57  ;;  %v510_v12 = vld [vmem:[%s4012_s5 + $0x160] sm:$0xff]  ;;  %v1237_v41 = vsel %vm1236_vm6, 1, %v3113_v15  ;;  %vm1594_vm7 = vcmp.lt.s32.totalorder %v1593_v40, %v3455_v32 }
  0x40   : > { %589 = vmatmul.mubr.f32.vlgmr.msra.gmra.mrb[0].mxu0 %v3442_v27  ;;  %v3682_v19 = vpack.c.bf16 %v513_v16, %v510_v12  ;;  %1060 = vperm.xlu1 %3020, %v1058_v37   ;;  %v1595_v57 = vsel %vm1594_vm7, 1, %v3113_v15  ;;  %vm1950_vm8 = vcmp.lt.s32.totalorder %v1949_v44, %v3455_v32  ;;  %v521_v12 = vld [vmem:[%s3193_s28] sm:$0xff] }
  0x41   : > { %2615 = vmatpush1.bf16.msra.mxu0 %v3444_v28  ;;  %771 = vmatprep.mubr.f32.mxu0 %v4019_v9  ;;  %v1951_v58 = vsel %vm1950_vm8, 1, %v3113_v15  ;;  %v3740_v44 = vld [vmem:[%s4011_s4] ss:$0 sm:$0xff] }
  0x42   : > { %2617 = vmatprep.subr.bf16.mxu0 %v3458_v33  ;;  %2611 = vmatpush3.bf16.msra.mxu1 %v3488_v49  ;;  %4047 = vst [vmem:[#allocation13_spill] sm:$0xff] %v3740_v44 }
  0x43   : > { %2644 = vmatprep.subr.bf16.mxu1 %v4021_v8 }
  0x44   : > { %1239 = vperm.xlu1 %3020, %v1237_v41  }
  0x45   : > { %2619 = vmatpush1.bf16.msra.mxu0 %v3482_v47  ;;  %2309 = vmatmul.mubr.f32.vlgmr.msra.gmra.mrb[0].mxu1 %v3442_v27 }
  0x46   : > { %2621 = vmatprep.subr.bf16.mxu0 %v3492_v51  ;;  %2646 = vmatpush3.bf16.msra.mxu1 %v3519_v2 }
  0x47   : > { %2647 = vmatprep.subr.bf16.mxu1 %v4021_v8  ;;  %2343 = vmatprep.mubr.msk.f32.mxu1 %vm3112_vm0, %v4019_v9 }
  0x48   : > { %1597 = vperm.xlu1 %3020, %v1595_v57  }
  0x49   : > { %2623 = vmatpush1.bf16.msra.mxu0 %v3513_v62 }
  0x4a   : > { %2625 = vmatprep.subr.bf16.mxu0 %v3523_v5  ;;  %2649 = vmatpush3.bf16.msra.mxu1 %v3550_v24 }
  0x4b   : > { %2650 = vmatprep.subr.bf16.mxu1 %v4021_v8 }
  0x4c   : > { %1953 = vperm.xlu1 %3020, %v1951_v58  }
  0x4d   : > { %2627 = vmatpush1.bf16.msra.mxu0 %v3544_v21 }
  0x4e   : > { %2629 = vmatprep.subr.bf16.mxu0 %v3554_v29  ;;  %2652 = vmatpush3.bf16.msra.mxu1 %v3581_v48 }
  0x4f   : > { %2653 = vmatprep.subr.bf16.mxu1 %v4021_v8 }
  0x51   : > { %2631 = vmatpush1.bf16.msra.mxu0 %v3575_v42 }
  0x52   : > { %2633 = vmatprep.subr.bf16.mxu0 %v3584_v50  ;;  %2655 = vmatpush3.bf16.msra.mxu1 %v3609_v3 }
  0x53   : > { %2656 = vmatprep.subr.bf16.mxu1 %v4021_v8 }
  0x55   : > { %2635 = vmatpush1.bf16.msra.mxu0 %v3603_v60 }
  0x56   : > { %2637 = vmatprep.subr.bf16.mxu0 %v3612_v6  ;;  %2658 = vmatpush3.bf16.msra.mxu1 %v3637_v38 }
  0x57   : > { %2659 = vmatprep.subr.bf16.mxu1 %v4021_v8 }
  0x59   : > { %2639 = vmatpush1.bf16.msra.mxu0 %v3631_v26 }
  0x5a   : > { %2641 = vmatprep.subr.bf16.mxu0 %v3640_v39  ;;  %2661 = vmatpush3.bf16.msra.mxu1 %v3656_v56 }
  0x5b   : > { %2662 = vmatprep.subr.bf16.mxu1 %v4021_v8 }
  0x5d   : > { %2643 = vmatpush1.bf16.msra.mxu0 %v3653_v53 }
  0x5e   : > { %2669 = vmatprep.subr.bf16.mxu0 %v3214_v4  ;;  %2664 = vmatpush3.bf16.msra.mxu1 %v3670_v1 }
  0x5f   : > { %2665 = vmatprep.subr.bf16.mxu1 %v4021_v8 }
  0x60   : > { %772 = vmatmul.mubr.f32.vlgmr.msra.gmra.mrb[2].mxu0 %v3667_v59 }
  0x61   : > { %2671 = vmatpush1.bf16.msra.mxu0 %v3227_v10  ;;  %956 = vmatprep.mubr.f32.mxu0 %v4019_v9 }
  0x62   : > { %2673 = vmatprep.subr.bf16.mxu0 %v3229_v11  ;;  %2667 = vmatpush3.bf16.msra.mxu1 %v3682_v19 }
  0x63   : > { %2700 = vmatprep.subr.bf16.mxu1 %v4021_v8 }
  0x65   : > { %2675 = vmatpush1.bf16.msra.mxu0 %v3249_v17  ;;  %2344 = vmatmul.mubr.f32.vlgmr.msra.gmra.mrb[2].mxu1 %v3667_v59 }
  0x66   : > { %2677 = vmatprep.subr.bf16.mxu0 %v3252_v18  ;;  %2702 = vmatpush3.bf16.msra.mxu1 %v3290_v31 }
  0x67   : > { %2703 = vmatprep.subr.bf16.mxu1 %v4021_v8  ;;  %2378 = vmatprep.mubr.msk.f32.mxu1 %vm3112_vm0, %v4019_v9 }
  0x69   : > { %2679 = vmatpush1.bf16.msra.mxu0 %v3267_v23 }
  0x6a   : > { %2681 = vmatprep.subr.bf16.mxu0 %v3273_v25  ;;  %2705 = vmatpush3.bf16.msra.mxu1 %v3302_v35 }
  0x6b   : > { %2706 = vmatprep.subr.bf16.mxu1 %v4021_v8 }
  0x6d   : > { %2683 = vmatpush1.bf16.msra.mxu0 %v3299_v34 }
  0x6e   : > { %2685 = vmatprep.subr.bf16.mxu0 %v3305_v36  ;;  %2708 = vmatpush3.bf16.msra.mxu1 %v3333_v45 }
  0x6f   : > { %2709 = vmatprep.subr.bf16.mxu1 %v4021_v8 }
  0x71   : > { %2687 = vmatpush1.bf16.msra.mxu0 %v3327_v43 }
  0x72   : > { %2689 = vmatprep.subr.bf16.mxu0 %v3336_v46  ;;  %2711 = vmatpush3.bf16.msra.mxu1 %v3361_v54 }
  0x73   : > { %2712 = vmatprep.subr.bf16.mxu1 %v4021_v8 }
  0x75   : > { %2691 = vmatpush1.bf16.msra.mxu0 %v3355_v52 }
  0x76   : > { %2693 = vmatprep.subr.bf16.mxu0 %v3364_v55  ;;  %2714 = vmatpush3.bf16.msra.mxu1 %v3389_v63 }
  0x77   : > { %2715 = vmatprep.subr.bf16.mxu1 %v4021_v8 }
  0x79   : > { %2695 = vmatpush1.bf16.msra.mxu0 %v3383_v61 }
  0x7a   : > { %2697 = vmatprep.subr.bf16.mxu0 %v3392_v0  ;;  %2717 = vmatpush3.bf16.msra.mxu1 %v3418_v13 }
  0x7b   : > { %2718 = vmatprep.subr.bf16.mxu1 %v4021_v8 }
  0x7d   : > { %2699 = vmatpush1.bf16.msra.mxu0 %v3412_v7 }
  0x7e   : > { %2725 = vmatprep.subr.bf16.mxu0 %v3421_v14  ;;  %2720 = vmatpush3.bf16.msra.mxu1 %v3450_v30 }
  0x7f   : > { %2721 = vmatprep.subr.bf16.mxu1 %v4021_v8 }
  0x82   : > { %2723 = vmatpush3.bf16.msra.mxu1 %v3488_v49 }
  0x83   : > { %2756 = vmatprep.subr.bf16.mxu1 %v4021_v8 }
 0x113   : > { %v590_v16 = vpop.f32.mrb[0].mxu0 }
 0x114   : > { %v665_v20 = vadd.f32 %v590_v16, %v521_v12  ;;  %v592_v9 = vpop.f32.mrb[1].mxu0  ;;  %v523_v12 = vld [vmem:[%s3193_s28 + $0x10] sm:$0xff]  ;;  %v2099_v16 = vld [vmem:[%s3198_s12 + $0x48] sm:$0xff] }
 0x115   : > { %v672_v8 = vadd.f32 %v592_v9, %v522_v22 }
 0x116   : > { %v2096_v37 = vmul.f32 -1.442695, %v665_v20 }
 0x117   : > { %v2097_v40 = vmul.f32 -1.442695, %v672_v8 }
 0x118   : > { %3021 = vpow2.f32 %v2096_v37  ;;  %v661_v41 = vpop.f32.mrb[0].mxu1 }
 0x119   : > { %v2310_v14 = vpop.f32.mrb[1].mxu1  ;;  %3023 = vpow2.f32 %v2097_v40  ;;  %v685_v58 = vadd.f32 %v3740_v44, %v661_v41 }
 0x122   : > { %v3022_v49 = vpop.eup %3021 }
 0x123   : > { %v669_v32 = vadd.f32 1.0, %v3022_v49  ;;  %v3024_v15 = vpop.eup %3023  ;;  %v2100_v49 = vld [vmem:[%s3198_s12 + $0x50] sm:$0xff] }
 0x124   : > { %v676_v57 = vadd.f32 1.0, %v3024_v15 }
 0x125   : > { %3025 = vrcp.f32 %v669_v32 }
 0x126   : > { %3027 = vrcp.f32 %v676_v57 }
 0x12f   : > { %v3026_v9 = vpop.eup %3025 }
 0x130   : > { %v686_v8 = vmul.f32 %v3026_v9, %v685_v58  ;;  %v3028_v7 = vpop.eup %3027  ;;  %v698_v9 = vpop.permute.xlu0 %697 }
 0x131   : > { %v689_v41 = vsub.f32 1.0, %v3028_v7  ;;  %v691_v58 = vmul.f32 %v3028_v7, %v3442_v27  ;;  %vm699_vm9 = vcmp.eq.s32.totalorder %v698_v9, 1  ;;  %v4049_v7 = vmov 0.0  }
 0x132   : > { %v687_v14 = vadd.f32 %v686_v8, %v523_v12 }
 0x133   : > { %v773_v20 = vpop.f32.mrb[2].mxu0 }
 0x134   : > { %3029 = vtanh.f32 %v687_v14  ;;  %v848_v22 = vadd.f32 %v2099_v16, %v773_v20  ;;  %v775_v37 = vpop.f32.mrb[3].mxu0 }
 0x135   : > { %v855_v32 = vadd.f32 %v2100_v49, %v775_v37  ;;  %v2101_v37 = vld [vmem:[%s3198_s12 + $0x58] sm:$0xff] }
 0x136   : > { %v2102_v40 = vmul.f32 -1.442695, %v848_v22 }
 0x137   : > { %v2103_v0 = vmul.f32 -1.442695, %v855_v32 }
 0x138   : > { %3031 = vpow2.f32 %v2102_v40  ;;  %v844_v15 = vpop.f32.mrb[2].mxu1 }
 0x139   : > { %v2345_v30 = vpop.f32.mrb[3].mxu1  ;;  %3033 = vpow2.f32 %v2103_v0  ;;  %v4048_v0 = vmov 0.0|0.0  }
 0x13a   : > { %v3765_v30 = vld [vmem:[%s4013_s6] ss:$0 sm:$0xff] }
 0x13b   : > { %v868_v22 = vadd.f32 %v3765_v30, %v844_v15 }
 0x13e   : > { %v3030_v44 = vpop.eup %3029 }
 0x13f   : > { %v690_v57 = vmul.f32 %v3030_v44, %v689_v41 }
 0x141   : > { %v692_v12 = vadd.f32 %v691_v58, %v690_v57 }
 0x142   : > { %v3032_v8 = vpop.eup %3031 }
 0x143   : > { %v852_v16 = vadd.f32 1.0, %v3032_v8  ;;  %v700_v14 = vsel %vm699_vm9, %v692_v12, 0.0  ;;  %v3748_v20 = vsel %vm699_vm9, %v692_v12, %v3442_v27  ;;  %v3034_v27 = vpop.eup %3033  ;;  %v882_v12 = vpop.permute.xlu0 %881 }
 0x144   : > { %701 = vst [vmem:[%s3188_s25] sm:$0xff] %v700_v14  ;;  %957 = vmatmul.mubr.f32.vlgmr.msra.gmra.mrb[4].mxu0 %v3748_v20  ;;  %2379 = vmatmul.mubr.f32.vlgmr.msra.gmra.mrb[4].mxu1 %v3748_v20  ;;  %v859_v44 = vadd.f32 1.0, %v3034_v27  ;;  %vm883_vm10 = vcmp.eq.s32.totalorder %v882_v12, 1  ;;  %v4051_v27 = vld [vmem:[#allocation7_spill] sm:$0xff] }
 0x145   : > { %3035 = vrcp.f32 %v852_v16  ;;  %2727 = vmatpush1.bf16.msra.mxu0 %v3444_v28  ;;  %2758 = vmatpush3.bf16.msra.mxu1 %v3519_v2 }
 0x146   : > { %2729 = vmatprep.subr.bf16.mxu0 %v3458_v33  ;;  %2759 = vmatprep.subr.bf16.mxu1 %v4048_v0  ;;  %3037 = vrcp.f32 %v859_v44  ;;  %v4052_v44 = vld [vmem:[#allocation8_spill] sm:$0xff] }
 0x147   : > { %1135 = vmatprep.mubr.f32.mxu0 %v4049_v7  ;;  %2413 = vmatprep.mubr.msk.f32.mxu1 %vm3112_vm0, %v4049_v7 }
 0x149   : > { %2731 = vmatpush1.bf16.msra.mxu0 %v3482_v47  ;;  %2761 = vmatpush3.bf16.msra.mxu1 %v3550_v24 }
 0x14a   : > { %2733 = vmatprep.subr.bf16.mxu0 %v3492_v51  ;;  %2762 = vmatprep.subr.bf16.mxu1 %v4048_v0 }
 0x14d   : > { %2735 = vmatpush1.bf16.msra.mxu0 %v3513_v62  ;;  %2764 = vmatpush3.bf16.msra.mxu1 %v3581_v48 }
 0x14e   : > { %2737 = vmatprep.subr.bf16.mxu0 %v3523_v5  ;;  %2765 = vmatprep.subr.bf16.mxu1 %v4048_v0 }
 0x14f   : > { %v3036_v49 = vpop.eup %3035 }
 0x150   : > { %v869_v40 = vmul.f32 %v3036_v49, %v868_v22  ;;  %v3038_v15 = vpop.eup %3037  ;;  %v4053_v22 = vld [vmem:[#allocation12_spill] sm:$0xff]  ;;  %v4054_v49 = vld [vmem:[#allocation10_spill] sm:$0xff] }
 0x151   : > { %2739 = vmatpush1.bf16.msra.mxu0 %v3544_v21  ;;  %2767 = vmatpush3.bf16.msra.mxu1 %v3609_v3  ;;  %v872_v41 = vsub.f32 1.0, %v3038_v15  ;;  %v874_v9 = vmul.f32 %v3038_v15, %v3667_v59 }
 0x152   : > { %v870_v32 = vadd.f32 %v2101_v37, %v869_v40  ;;  %2741 = vmatprep.subr.bf16.mxu0 %v3554_v29  ;;  %2768 = vmatprep.subr.bf16.mxu1 %v4048_v0  ;;  %v2106_v37 = vld [vmem:[%s3193_s28 + $0x18] sm:$0xff] }
 0x154   : > { %3039 = vtanh.f32 %v870_v32 }
 0x155   : > { %2743 = vmatpush1.bf16.msra.mxu0 %v3575_v42  ;;  %2770 = vmatpush3.bf16.msra.mxu1 %v3637_v38 }
 0x156   : > { %2745 = vmatprep.subr.bf16.mxu0 %v3584_v50  ;;  %2771 = vmatprep.subr.bf16.mxu1 %v4048_v0 }
 0x159   : > { %2747 = vmatpush1.bf16.msra.mxu0 %v3603_v60  ;;  %2773 = vmatpush3.bf16.msra.mxu1 %v3656_v56 }
 0x15a   : > { %2749 = vmatprep.subr.bf16.mxu0 %v3612_v6  ;;  %2774 = vmatprep.subr.bf16.mxu1 %v4048_v0 }
 0x15d   : > { %2751 = vmatpush1.bf16.msra.mxu0 %v3631_v26  ;;  %2776 = vmatpush3.bf16.msra.mxu1 %v3670_v1 }
 0x15e   : > { %v3040_v57 = vpop.eup %3039  ;;  %2753 = vmatprep.subr.bf16.mxu0 %v3640_v39  ;;  %2777 = vmatprep.subr.bf16.mxu1 %v4048_v0 }
 0x15f   : > { %v873_v58 = vmul.f32 %v3040_v57, %v872_v41  ;;  %v2107_v41 = vld [vmem:[%s3193_s28 + $0x20] sm:$0xff] }
 0x161   : > { %2755 = vmatpush1.bf16.msra.mxu0 %v3653_v53  ;;  %2779 = vmatpush3.bf16.msra.mxu1 %v3682_v19  ;;  %v875_v8 = vadd.f32 %v874_v9, %v873_v58 }
 0x162   : > { %2781 = vmatprep.subr.bf16.mxu0 %v3214_v4  ;;  %2812 = vmatprep.subr.bf16.mxu1 %v4048_v0 }
 0x163   : > { %v3797_v16 = vsel %vm883_vm10, %v875_v8, %v3667_v59  ;;  %v884_v14 = vsel %vm883_vm10, %v875_v8, 0.0  ;;  %v4050_v59 = vld [vmem:[#allocation11_spill] sm:$0xff] }
 0x164   : > { %1136 = vmatmul.mubr.f32.vlgmr.msra.gmra.mrb[6].mxu0 %v3797_v16  ;;  %2414 = vmatmul.mubr.f32.vlgmr.msra.gmra.mrb[6].mxu1 %v3797_v16  ;;  %2105 = vst [vmem:[%s3203_s18 + $0x18] sm:$0xff] %v884_v14 }
 0x165   : > { %2783 = vmatpush1.bf16.msra.mxu0 %v3227_v10  ;;  %2814 = vmatpush3.bf16.msra.mxu1 %v3290_v31 }
 0x166   : > { %2785 = vmatprep.subr.bf16.mxu0 %v3229_v11  ;;  %2815 = vmatprep.subr.bf16.mxu1 %v4048_v0 }
 0x167   : > { %1314 = vmatprep.mubr.f32.mxu0 %v4049_v7  ;;  %2448 = vmatprep.mubr.msk.f32.mxu1 %vm3112_vm0, %v4049_v7 }
 0x169   : > { %2787 = vmatpush1.bf16.msra.mxu0 %v3249_v17  ;;  %2817 = vmatpush3.bf16.msra.mxu1 %v3302_v35 }
 0x16a   : > { %2789 = vmatprep.subr.bf16.mxu0 %v3252_v18  ;;  %2818 = vmatprep.subr.bf16.mxu1 %v4048_v0 }
 0x16d   : > { %2791 = vmatpush1.bf16.msra.mxu0 %v3267_v23  ;;  %2820 = vmatpush3.bf16.msra.mxu1 %v3333_v45 }
 0x16e   : > { %2793 = vmatprep.subr.bf16.mxu0 %v3273_v25  ;;  %2821 = vmatprep.subr.bf16.mxu1 %v4048_v0 }
 0x171   : > { %2795 = vmatpush1.bf16.msra.mxu0 %v3299_v34  ;;  %2823 = vmatpush3.bf16.msra.mxu1 %v3361_v54 }
 0x172   : > { %2797 = vmatprep.subr.bf16.mxu0 %v3305_v36  ;;  %2824 = vmatprep.subr.bf16.mxu1 %v4048_v0 }
 0x175   : > { %2799 = vmatpush1.bf16.msra.mxu0 %v3327_v43  ;;  %2826 = vmatpush3.bf16.msra.mxu1 %v3389_v63 }
 0x176   : > { %2801 = vmatprep.subr.bf16.mxu0 %v3336_v46  ;;  %2827 = vmatprep.subr.bf16.mxu1 %v4048_v0 }
 0x179   : > { %2803 = vmatpush1.bf16.msra.mxu0 %v3355_v52  ;;  %2829 = vmatpush3.bf16.msra.mxu1 %v3418_v13 }
 0x17a   : > { %2805 = vmatprep.subr.bf16.mxu0 %v3364_v55  ;;  %2830 = vmatprep.subr.bf16.mxu1 %v4048_v0  ;;  %v2112_v55 = vld [vmem:[%s3198_s12 + $0x30] sm:$0xff] }
 0x17d   : > { %2807 = vmatpush1.bf16.msra.mxu0 %v3383_v61  ;;  %2832 = vmatpush3.bf16.msra.mxu1 %v4050_v59 }
 0x17e   : > { %2809 = vmatprep.subr.bf16.mxu0 %v4051_v27  ;;  %2833 = vmatprep.subr.bf16.mxu1 %v4048_v0  ;;  %v4055_v27 = vld [vmem:[#allocation13_spill] sm:$0xff] }
 0x181   : > { %2811 = vmatpush1.bf16.msra.mxu0 %v4052_v44  ;;  %2835 = vmatpush3.bf16.msra.mxu1 %v4053_v22 }
 0x182   : > { %2837 = vmatprep.subr.bf16.mxu0 %v4054_v49  ;;  %2868 = vmatprep.subr.bf16.mxu1 %v4048_v0 }
 0x217   : > { %v958_v40 = vpop.f32.mrb[4].mxu0  ;;  %v1029_v32 = vpop.f32.mrb[4].mxu1 }
 0x218   : > { %v1033_v15 = vadd.f32 %v2106_v37, %v958_v40  ;;  %v960_v57 = vpop.f32.mrb[5].mxu0  ;;  %v2380_v58 = vpop.f32.mrb[5].mxu1  ;;  %v1047_v59 = vadd.f32 %v4055_v27, %v1029_v32  ;;  %v2108_v37 = vld [vmem:[%s3193_s28 + $0x28] sm:$0xff] }
 0x219   : > { %v1040_v12 = vadd.f32 %v2107_v41, %v960_v57  ;;  %v2113_v57 = vld [vmem:[%s3198_s12 + $0x38] sm:$0xff] }
 0x21a   : > { %v2109_v9 = vmul.f32 -1.442695, %v1033_v15 }
 0x21b   : > { %v2110_v8 = vmul.f32 -1.442695, %v1040_v12 }
 0x21c   : > { %3041 = vpow2.f32 %v2109_v9 }
 0x21d   : > { %3043 = vpow2.f32 %v2110_v8 }
 0x226   : > { %v3042_v14 = vpop.eup %3041 }
 0x227   : > { %v1037_v22 = vadd.f32 1.0, %v3042_v14  ;;  %v3044_v49 = vpop.eup %3043 }
 0x228   : > { %v1044_v44 = vadd.f32 1.0, %v3044_v49 }
 0x229   : > { %3045 = vrcp.f32 %v1037_v22 }
 0x22a   : > { %3047 = vrcp.f32 %v1044_v44 }
 0x233   : > { %v3046_v61 = vpop.eup %3045 }
 0x234   : > { %v1048_v40 = vmul.f32 %v3046_v61, %v1047_v59  ;;  %v3048_v22 = vpop.eup %3047  ;;  %v1061_v61 = vpop.permute.xlu1 %1060 }
 0x235   : > { %v1051_v32 = vsub.f32 1.0, %v3048_v22  ;;  %v1053_v44 = vmul.f32 %v3048_v22, %v3748_v20  ;;  %vm1062_vm11 = vcmp.eq.s32.totalorder %v1061_v61, 1 }
 0x236   : > { %v1049_v58 = vadd.f32 %v2108_v37, %v1048_v40 }
 0x237   : > { %v1137_v13 = vpop.f32.mrb[6].mxu0  ;;  %v1208_v15 = vpop.f32.mrb[6].mxu1 }
 0x238   : > { %3049 = vtanh.f32 %v1049_v58  ;;  %v1212_v41 = vadd.f32 %v2112_v55, %v1137_v13  ;;  %v1139_v9 = vpop.f32.mrb[7].mxu0  ;;  %v2415_v12 = vpop.f32.mrb[7].mxu1 }
 0x239   : > { %v1219_v14 = vadd.f32 %v2113_v57, %v1139_v9  ;;  %v2114_v9 = vld [vmem:[%s3198_s12 + $0x40] sm:$0xff]  ;;  %v1240_v61 = vpop.permute.xlu1 %1239 }
 0x23a   : > { %v2115_v8 = vmul.f32 -1.442695, %v1212_v41  ;;  %v1226_v41 = vadd.f32 %v3765_v30, %v1208_v15  ;;  %vm1241_vm12 = vcmp.eq.s32.totalorder %v1240_v61, 1 }
 0x23b   : > { %v2116_v49 = vmul.f32 -1.442695, %v1219_v14 }
 0x23c   : > { %3051 = vpow2.f32 %v2115_v8 }
 0x23d   : > { %3053 = vpow2.f32 %v2116_v49 }
 0x242   : > { %v3050_v27 = vpop.eup %3049 }
 0x243   : > { %v1052_v59 = vmul.f32 %v3050_v27, %v1051_v32 }
 0x245   : > { %v1054_v37 = vadd.f32 %v1053_v44, %v1052_v59 }
 0x246   : > { %v3052_v40 = vpop.eup %3051 }
 0x247   : > { %v1216_v55 = vadd.f32 1.0, %v3052_v40  ;;  %v1063_v13 = vsel %vm1062_vm11, %v1054_v37, 0.0  ;;  %v3845_v58 = vsel %vm1062_vm11, %v1054_v37, %v3748_v20  ;;  %v3054_v20 = vpop.eup %3053 }
 0x248   : > { %2111 = vst [vmem:[%s3188_s25 + $0x8] sm:$0xff] %v1063_v13  ;;  %1315 = vmatmul.mubr.f32.vlgmr.msra.gmra.mrb[8].mxu0 %v3845_v58  ;;  %2449 = vmatmul.mubr.f32.vlgmr.msra.gmra.mrb[8].mxu1 %v3845_v58  ;;  %v1223_v27 = vadd.f32 1.0, %v3054_v20 }
 0x249   : > { %3055 = vrcp.f32 %v1216_v55  ;;  %2839 = vmatpush1.bf16.msra.mxu0 %v3444_v28  ;;  %2870 = vmatpush3.bf16.msra.mxu1 %v3519_v2 }
 0x24a   : > { %2841 = vmatprep.subr.bf16.mxu0 %v3458_v33  ;;  %2871 = vmatprep.subr.bf16.mxu1 %v4048_v0  ;;  %3057 = vrcp.f32 %v1223_v27  ;;  %v4064_v27 = vld [vmem:[#allocation13_spill] sm:$0xff] }
 0x24b   : > { %1493 = vmatprep.mubr.f32.mxu0 %v4049_v7  ;;  %2483 = vmatprep.mubr.msk.f32.mxu1 %vm3112_vm0, %v4049_v7 }
 0x24d   : > { %2843 = vmatpush1.bf16.msra.mxu0 %v3482_v47  ;;  %2873 = vmatpush3.bf16.msra.mxu1 %v3550_v24 }
 0x24e   : > { %2845 = vmatprep.subr.bf16.mxu0 %v3492_v51  ;;  %2874 = vmatprep.subr.bf16.mxu1 %v4048_v0 }
 0x251   : > { %2847 = vmatpush1.bf16.msra.mxu0 %v3513_v62  ;;  %2876 = vmatpush3.bf16.msra.mxu1 %v3581_v48 }
 0x252   : > { %2849 = vmatprep.subr.bf16.mxu0 %v3523_v5  ;;  %2877 = vmatprep.subr.bf16.mxu1 %v4048_v0 }
 0x253   : > { %v3056_v57 = vpop.eup %3055 }
 0x254   : > { %v1227_v12 = vmul.f32 %v3056_v57, %v1226_v41  ;;  %v3058_v15 = vpop.eup %3057 }
 0x255   : > { %2851 = vmatpush1.bf16.msra.mxu0 %v3544_v21  ;;  %2879 = vmatpush3.bf16.msra.mxu1 %v3609_v3  ;;  %v1230_v14 = vsub.f32 1.0, %v3058_v15  ;;  %v1232_v32 = vmul.f32 %v3058_v15, %v3797_v16 }
 0x256   : > { %v1228_v8 = vadd.f32 %v2114_v9, %v1227_v12  ;;  %2853 = vmatprep.subr.bf16.mxu0 %v3554_v29  ;;  %2880 = vmatprep.subr.bf16.mxu1 %v4048_v0  ;;  %v2120_v9 = vld [vmem:[%s3193_s28 + $0x40] sm:$0xff] }
 0x258   : > { %3059 = vtanh.f32 %v1228_v8  ;;  %v2124_v8 = vld [vmem:[%s3198_s12 + $0x18] sm:$0xff] }
 0x259   : > { %2855 = vmatpush1.bf16.msra.mxu0 %v3575_v42  ;;  %2882 = vmatpush3.bf16.msra.mxu1 %v3637_v38 }
 0x25a   : > { %2857 = vmatprep.subr.bf16.mxu0 %v3584_v50  ;;  %2883 = vmatprep.subr.bf16.mxu1 %v4048_v0 }
 0x25d   : > { %2859 = vmatpush1.bf16.msra.mxu0 %v3603_v60  ;;  %2885 = vmatpush3.bf16.msra.mxu1 %v3656_v56 }
 0x25e   : > { %2861 = vmatprep.subr.bf16.mxu0 %v3612_v6  ;;  %2886 = vmatprep.subr.bf16.mxu1 %v4048_v0 }
 0x261   : > { %2863 = vmatpush1.bf16.msra.mxu0 %v3631_v26  ;;  %2888 = vmatpush3.bf16.msra.mxu1 %v3670_v1 }
 0x262   : > { %v3060_v22 = vpop.eup %3059  ;;  %2865 = vmatprep.subr.bf16.mxu0 %v3640_v39  ;;  %2889 = vmatprep.subr.bf16.mxu1 %v4048_v0 }
 0x263   : > { %v1231_v49 = vmul.f32 %v3060_v22, %v1230_v14 }
 0x265   : > { %v1233_v59 = vadd.f32 %v1232_v32, %v1231_v49  ;;  %2867 = vmatpush1.bf16.msra.mxu0 %v3653_v53  ;;  %2891 = vmatpush3.bf16.msra.mxu1 %v3682_v19  ;;  %v2125_v32 = vld [vmem:[%s3198_s12 + $0x20] sm:$0xff] }
 0x266   : > { %2893 = vmatprep.subr.bf16.mxu0 %v3214_v4  ;;  %2924 = vmatprep.subr.bf16.mxu1 %v4048_v0  ;;  %v4056_v4 = vld [vmem:[#allocation9_spill] sm:$0xff] }
 0x267   : > { %v1242_v44 = vsel %vm1241_vm12, %v1233_v59, 0.0  ;;  %v3889_v37 = vsel %vm1241_vm12, %v1233_v59, %v3797_v16 }
 0x268   : > { %2117 = vst [vmem:[%s3203_s18 + $0x10] sm:$0xff] %v1242_v44  ;;  %1494 = vmatmul.mubr.f32.vlgmr.msra.gmra.mrb[10].mxu0 %v3889_v37  ;;  %2484 = vmatmul.mubr.f32.vlgmr.msra.gmra.mrb[10].mxu1 %v3889_v37 }
 0x269   : > { %2895 = vmatpush1.bf16.msra.mxu0 %v3227_v10  ;;  %2926 = vmatpush3.bf16.msra.mxu1 %v3290_v31  ;;  %v4057_v10 = vld [vmem:[#allocation5_spill] sm:$0xff]  ;;  %v4063_v31 = vld [vmem:[#allocation10_spill] sm:$0xff] }
 0x26a   : > { %2897 = vmatprep.subr.bf16.mxu0 %v3229_v11  ;;  %2927 = vmatprep.subr.bf16.mxu1 %v4048_v0  ;;  %v4058_v11 = vld [vmem:[#allocation6_spill] sm:$0xff] }
 0x26b   : > { %1672 = vmatprep.mubr.f32.mxu0 %v4049_v7  ;;  %2518 = vmatprep.mubr.msk.f32.mxu1 %vm3112_vm0, %v4049_v7 }
 0x26d   : > { %2899 = vmatpush1.bf16.msra.mxu0 %v3249_v17  ;;  %2929 = vmatpush3.bf16.msra.mxu1 %v3302_v35  ;;  %v4059_v17 = vld [vmem:[#allocation11_spill] sm:$0xff] }
 0x26e   : > { %2901 = vmatprep.subr.bf16.mxu0 %v3252_v18  ;;  %2930 = vmatprep.subr.bf16.mxu1 %v4048_v0  ;;  %v4060_v18 = vld [vmem:[#allocation7_spill] sm:$0xff] }
 0x271   : > { %2903 = vmatpush1.bf16.msra.mxu0 %v3267_v23  ;;  %2932 = vmatpush3.bf16.msra.mxu1 %v3333_v45  ;;  %v4061_v23 = vld [vmem:[#allocation8_spill] sm:$0xff]  ;;  %v2119_v45 = vld [vmem:[%s3193_s28 + $0x38] sm:$0xff] }
 0x272   : > { %2905 = vmatprep.subr.bf16.mxu0 %v3273_v25  ;;  %2933 = vmatprep.subr.bf16.mxu1 %v4048_v0  ;;  %v4062_v25 = vld [vmem:[#allocation12_spill] sm:$0xff] }
 0x275   : > { %2907 = vmatpush1.bf16.msra.mxu0 %v3299_v34  ;;  %2935 = vmatpush3.bf16.msra.mxu1 %v3361_v54  ;;  %v2118_v34 = vld [vmem:[%s3193_s28 + $0x30] sm:$0xff] }
 0x276   : > { %2909 = vmatprep.subr.bf16.mxu0 %v3305_v36  ;;  %2936 = vmatprep.subr.bf16.mxu1 %v4048_v0 }
 0x279   : > { %2911 = vmatpush1.bf16.msra.mxu0 %v3327_v43  ;;  %2938 = vmatpush3.bf16.msra.mxu1 %v3389_v63 }
 0x27a   : > { %2913 = vmatprep.subr.bf16.mxu0 %v3336_v46  ;;  %2939 = vmatprep.subr.bf16.mxu1 %v4048_v0 }
 0x27d   : > { %2915 = vmatpush1.bf16.msra.mxu0 %v3355_v52  ;;  %2941 = vmatpush3.bf16.msra.mxu1 %v4056_v4 }
 0x27e   : > { %2917 = vmatprep.subr.bf16.mxu0 %v4057_v10  ;;  %2942 = vmatprep.subr.bf16.mxu1 %v4048_v0 }
 0x281   : > { %2919 = vmatpush1.bf16.msra.mxu0 %v4058_v11  ;;  %2944 = vmatpush3.bf16.msra.mxu1 %v4059_v17 }
 0x282   : > { %2921 = vmatprep.subr.bf16.mxu0 %v4060_v18  ;;  %2945 = vmatprep.subr.bf16.mxu1 %v4048_v0 }
 0x285   : > { %2923 = vmatpush1.bf16.msra.mxu0 %v4061_v23  ;;  %2947 = vmatpush3.bf16.msra.mxu1 %v4062_v25 }
 0x286   : > { %2949 = vmatprep.subr.bf16.mxu0 %v4063_v31  ;;  %2980 = vmatprep.subr.bf16.mxu1 %v4048_v0  ;;  %v1419_v31 = vpop.permute.xlu0 %1418 }
 0x287   : > { %vm1420_vm13 = vcmp.eq.s32.totalorder %v1419_v31, 1 }
 0x31b   : > { %v1316_v35 = vpop.f32.mrb[8].mxu0  ;;  %v1387_v36 = vpop.f32.mrb[8].mxu1 }
 0x31c   : > { %v1391_v43 = vadd.f32 %v2118_v34, %v1316_v35  ;;  %v1318_v46 = vpop.f32.mrb[9].mxu0  ;;  %v2450_v52 = vpop.f32.mrb[9].mxu1  ;;  %v1405_v41 = vadd.f32 %v4064_v27, %v1387_v36 }
 0x31d   : > { %v1398_v63 = vadd.f32 %v2119_v45, %v1318_v46 }
 0x31e   : > { %v2121_v54 = vmul.f32 -1.442695, %v1391_v43 }
 0x31f   : > { %v2122_v16 = vmul.f32 -1.442695, %v1398_v63 }
 0x320   : > { %3061 = vpow2.f32 %v2121_v54 }
 0x321   : > { %3063 = vpow2.f32 %v2122_v16 }
 0x32a   : > { %v3062_v40 = vpop.eup %3061 }
 0x32b   : > { %v1395_v55 = vadd.f32 1.0, %v3062_v40  ;;  %v3064_v13 = vpop.eup %3063  ;;  %v2132_v40 = vld [vmem:[%s3193_s28 + $0x58] sm:$0xff] }
 0x32c   : > { %v1402_v20 = vadd.f32 1.0, %v3064_v13  ;;  %v1783_v13 = vld [vmem:[%s3198_s12] sm:$0xff] }
 0x32d   : > { %3065 = vrcp.f32 %v1395_v55 }
 0x32e   : > { %3067 = vrcp.f32 %v1402_v20 }
 0x337   : > { %v3066_v57 = vpop.eup %3065 }
 0x338   : > { %v1406_v12 = vmul.f32 %v3066_v57, %v1405_v41  ;;  %v3068_v10 = vpop.eup %3067 }
 0x339   : > { %v1409_v17 = vsub.f32 1.0, %v3068_v10  ;;  %v1411_v25 = vmul.f32 %v3068_v10, %v3845_v58 }
 0x33a   : > { %v1407_v15 = vadd.f32 %v2120_v9, %v1406_v12  ;;  %v1784_v12 = vld [vmem:[%s3198_s12 + $0x8] sm:$0xff] }
 0x33b   : > { %v1495_v14 = vpop.f32.mrb[10].mxu0  ;;  %v1566_v22 = vpop.f32.mrb[10].mxu1 }
 0x33c   : > { %3069 = vtanh.f32 %v1407_v15  ;;  %v1570_v49 = vadd.f32 %v2124_v8, %v1495_v14  ;;  %v1497_v61 = vpop.f32.mrb[11].mxu0  ;;  %v2485_v59 = vpop.f32.mrb[11].mxu1 }
 0x33d   : > { %v1577_v4 = vadd.f32 %v2125_v32, %v1497_v61  ;;  %v1777_v59 = vpop.permute.xlu0 %1776 }
 0x33e   : > { %v2127_v44 = vmul.f32 -1.442695, %v1570_v49  ;;  %vm1778_vm15 = vcmp.eq.s32.totalorder %v1777_v59, 1 }
 0x33f   : > { %v2128_v11 = vmul.f32 -1.442695, %v1577_v4 }
 0x340   : > { %3071 = vpow2.f32 %v2127_v44 }
 0x341   : > { %3073 = vpow2.f32 %v2128_v11 }
 0x346   : > { %v3070_v18 = vpop.eup %3069 }
 0x347   : > { %v1410_v23 = vmul.f32 %v3070_v18, %v1409_v17 }
 0x349   : > { %v1412_v34 = vadd.f32 %v1411_v25, %v1410_v23 }
 0x34a   : > { %v3072_v35 = vpop.eup %3071 }
 0x34b   : > { %v1574_v36 = vadd.f32 1.0, %v3072_v35  ;;  %v1421_v43 = vsel %vm1420_vm13, %v1412_v34, 0.0  ;;  %v3937_v45 = vsel %vm1420_vm13, %v1412_v34, %v3845_v58  ;;  %v3074_v58 = vpop.eup %3073 }
 0x34c   : > { %2123 = vst [vmem:[%s3188_s25 + $0x10] sm:$0xff] %v1421_v43  ;;  %1673 = vmatmul.mubr.f32.vlgmr.msra.gmra.mrb[12].mxu0 %v3937_v45  ;;  %2519 = vmatmul.mubr.f32.vlgmr.msra.gmra.mrb[12].mxu1 %v3937_v45 }
 0x34d   : > { %3075 = vrcp.f32 %v1574_v36  ;;  %2951 = vmatpush1.bf16.msra.mxu0 %v3444_v28  ;;  %2982 = vmatpush3.bf16.msra.mxu1 %v3519_v2  ;;  %v1581_v28 = vadd.f32 1.0, %v3074_v58  ;;  %v1785_v36 = vld [vmem:[%s3198_s12 + $0x10] sm:$0xff] }
 0x34e   : > { %2953 = vmatprep.subr.bf16.mxu0 %v3458_v33  ;;  %2983 = vmatprep.subr.bf16.mxu1 %v4048_v0  ;;  %v1584_v33 = vadd.f32 %v3765_v30, %v1566_v22 }
 0x34f   : > { %1850 = vmatprep.mubr.f32.mxu0 %v4049_v7  ;;  %2553 = vmatprep.mubr.msk.f32.mxu1 %vm3112_vm0, %v4049_v7  ;;  %v2126_v7 = vld [vmem:[%s3198_s12 + $0x28] sm:$0xff]  ;;  %3077 = vrcp.f32 %v1581_v28 }
 0x351   : > { %2955 = vmatpush1.bf16.msra.mxu0 %v3482_v47  ;;  %2985 = vmatpush3.bf16.msra.mxu1 %v3550_v24 }
 0x352   : > { %2957 = vmatprep.subr.bf16.mxu0 %v3492_v51  ;;  %2986 = vmatprep.subr.bf16.mxu1 %v4048_v0 }
 0x355   : > { %2959 = vmatpush1.bf16.msra.mxu0 %v3513_v62  ;;  %2988 = vmatpush3.bf16.msra.mxu1 %v3581_v48 }
 0x356   : > { %2961 = vmatprep.subr.bf16.mxu0 %v3523_v5  ;;  %2989 = vmatprep.subr.bf16.mxu1 %v4048_v0 }
 0x357   : > { %v3076_v2 = vpop.eup %3075 }
 0x358   : > { %v1585_v47 = vmul.f32 %v3076_v2, %v1584_v33 }
 0x359   : > { %2963 = vmatpush1.bf16.msra.mxu0 %v3544_v21  ;;  %2991 = vmatpush3.bf16.msra.mxu1 %v3609_v3  ;;  %v3078_v62 = vpop.eup %3077  ;;  %v2130_v3 = vld [vmem:[%s3193_s28 + $0x48] sm:$0xff] }
 0x35a   : > { %v1586_v51 = vadd.f32 %v2126_v7, %v1585_v47  ;;  %2965 = vmatprep.subr.bf16.mxu0 %v3554_v29  ;;  %2992 = vmatprep.subr.bf16.mxu1 %v4048_v0  ;;  %v1588_v5 = vsub.f32 1.0, %v3078_v62  ;;  %v1590_v29 = vmul.f32 %v3078_v62, %v3889_v37 }
 0x35c   : > { %3079 = vtanh.f32 %v1586_v51 }
 0x35d   : > { %2967 = vmatpush1.bf16.msra.mxu0 %v3575_v42  ;;  %2994 = vmatpush3.bf16.msra.mxu1 %v3637_v38  ;;  %v1598_v42 = vpop.permute.xlu1 %1597 }
 0x35e   : > { %2969 = vmatprep.subr.bf16.mxu0 %v3584_v50  ;;  %2995 = vmatprep.subr.bf16.mxu1 %v4048_v0  ;;  %vm1599_vm14 = vcmp.eq.s32.totalorder %v1598_v42, 1 }
 0x361   : > { %2971 = vmatpush1.bf16.msra.mxu0 %v3603_v60  ;;  %2997 = vmatpush3.bf16.msra.mxu1 %v3656_v56  ;;  %v1954_v2 = vpop.permute.xlu1 %1953 }
 0x362   : > { %2973 = vmatprep.subr.bf16.mxu0 %v3612_v6  ;;  %2998 = vmatprep.subr.bf16.mxu1 %v4048_v0  ;;  %vm1955_vm0 = vcmp.eq.s32.totalorder %v1954_v2, 1 }
 0x365   : > { %2975 = vmatpush1.bf16.msra.mxu0 %v3631_v26  ;;  %3000 = vmatpush3.bf16.msra.mxu1 %v3670_v1 }
 0x366   : > { %v3080_v21 = vpop.eup %3079  ;;  %2977 = vmatprep.subr.bf16.mxu0 %v3640_v39  ;;  %3001 = vmatprep.subr.bf16.mxu1 %v4048_v0  ;;  %v2131_v39 = vld [vmem:[%s3193_s28 + $0x50] sm:$0xff] }
 0x367   : > { %v1589_v24 = vmul.f32 %v3080_v21, %v1588_v5 }
 0x369   : > { %2979 = vmatpush1.bf16.msra.mxu0 %v3653_v53  ;;  %3003 = vmatpush3.bf16.msra.mxu1 %v3682_v19  ;;  %v1591_v48 = vadd.f32 %v1590_v29, %v1589_v24 }
 0x36b   : > { %v1600_v50 = vsel %vm1599_vm14, %v1591_v48, 0.0  ;;  %v3979_v60 = vsel %vm1599_vm14, %v1591_v48, %v3889_v37 }
 0x36c   : > { %2129 = vst [vmem:[%s3203_s18 + $0x8] sm:$0xff] %v1600_v50  ;;  %1851 = vmatmul.mubr.f32.vlgmr.msra.gmra.mrb[14].mxu0 %v3979_v60  ;;  %2554 = vmatmul.mubr.f32.vlgmr.msra.gmra.mrb[14].mxu1 %v3979_v60 }
 0x41f   : > { %v1674_v6 = vpop.f32.mrb[12].mxu0  ;;  %v1745_v26 = vpop.f32.mrb[12].mxu1 }
 0x420   : > { %v1749_v38 = vadd.f32 %v2130_v3, %v1674_v6  ;;  %v1676_v53 = vpop.f32.mrb[13].mxu0  ;;  %v2520_v56 = vpop.f32.mrb[13].mxu1  ;;  %v1763_v63 = vadd.f32 %v4064_v27, %v1745_v26 }
 0x421   : > { %v1756_v19 = vadd.f32 %v2131_v39, %v1676_v53 }
 0x422   : > { %v2133_v1 = vmul.f32 -1.442695, %v1749_v38 }
 0x423   : > { %v2134_v0 = vmul.f32 -1.442695, %v1756_v19 }
 0x424   : > { %3081 = vpow2.f32 %v2133_v1 }
 0x425   : > { %3083 = vpow2.f32 %v2134_v0 }
 0x42e   : > { %v3082_v37 = vpop.eup %3081 }
 0x42f   : > { %v1753_v46 = vadd.f32 1.0, %v3082_v37  ;;  %v3084_v52 = vpop.eup %3083 }
 0x430   : > { %v1760_v54 = vadd.f32 1.0, %v3084_v52 }
 0x431   : > { %3085 = vrcp.f32 %v1753_v46 }
 0x432   : > { %3087 = vrcp.f32 %v1760_v54 }
 0x43b   : > { %v3086_v16 = vpop.eup %3085 }
 0x43c   : > { %v1764_v55 = vmul.f32 %v3086_v16, %v1763_v63  ;;  %v3088_v49 = vpop.eup %3087 }
 0x43d   : > { %v1767_v27 = vsub.f32 1.0, %v3088_v49  ;;  %v1769_v4 = vmul.f32 %v3088_v49, %v3937_v45 }
 0x43e   : > { %v1765_v20 = vadd.f32 %v2132_v40, %v1764_v55 }
 0x43f   : > { %v1852_v41 = vpop.f32.mrb[14].mxu0  ;;  %v1923_v57 = vpop.f32.mrb[14].mxu1 }
 0x440   : > { %3089 = vtanh.f32 %v1765_v20  ;;  %v1927_v9 = vadd.f32 %v1852_v41, %v1783_v13  ;;  %v1854_v8 = vpop.f32.mrb[15].mxu0  ;;  %v2555_v15 = vpop.f32.mrb[15].mxu1  ;;  %v1941_v34 = vadd.f32 %v3765_v30, %v1923_v57 }
 0x441   : > { %v1934_v22 = vadd.f32 %v1854_v8, %v1784_v12 }
 0x442   : > { %v2136_v14 = vmul.f32 -1.442695, %v1927_v9 }
 0x443   : > { %v2137_v32 = vmul.f32 -1.442695, %v1934_v22 }
 0x444   : > { %3091 = vpow2.f32 %v2136_v14 }
 0x445   : > { %3093 = vpow2.f32 %v2137_v32 }
 0x44a   : > { %v3090_v61 = vpop.eup %3089 }
 0x44b   : > { %v1768_v44 = vmul.f32 %v3090_v61, %v1767_v27 }
 0x44d   : > { %v1770_v10 = vadd.f32 %v1769_v4, %v1768_v44 }
 0x44e   : > { %v3092_v11 = vpop.eup %3091 }
 0x44f   : > { %v1779_v17 = vsel %vm1778_vm15, %v1770_v10, 0.0  ;;  %v1782_v18 = vsel %vm1778_vm15, %v1770_v10, %v3937_v45  ;;  %v1931_v23 = vadd.f32 1.0, %v3092_v11  ;;  %v3094_v25 = vpop.eup %3093 }
 0x450   : > { %2135 = vst [vmem:[%s3188_s25 + $0x18] sm:$0xff] %v1779_v17  ;;  %1959 = vst [vmem:[#allocation2] sm:$0xff] %v1782_v18  ;;  %v1938_v31 = vadd.f32 1.0, %v3094_v25 }
 0x451   : > { %1961 = vst [vmem:[%s4016_s9] sm:$0xff] %v1782_v18  ;;  %3095 = vrcp.f32 %v1931_v23 }
 0x452   : > { %3097 = vrcp.f32 %v1938_v31 }
 0x45b   : > { %v3096_v35 = vpop.eup %3095 }
 0x45c   : > { %v1942_v43 = vmul.f32 %v3096_v35, %v1941_v34  ;;  %v3098_v45 = vpop.eup %3097 }
 0x45d   : > { %v1945_v28 = vsub.f32 1.0, %v3098_v45  ;;  %v1947_v47 = vmul.f32 %v3098_v45, %v3979_v60 }
 0x45e   : > { %v1943_v58 = vadd.f32 %v1942_v43, %v1785_v36 }
 0x460   : > { %3099 = vtanh.f32 %v1943_v58 }
 0x46a   : > { %v3100_v33 = vpop.eup %3099 }
 0x46b   : > { %v1946_v7 = vmul.f32 %v3100_v33, %v1945_v28 }
 0x46d   : > { %v1948_v51 = vadd.f32 %v1947_v47, %v1946_v7 }
 0x46f   : > { %v1956_v62 = vsel %vm1955_vm0, %v1948_v51, 0.0  ;;  %v1958_v5 = vsel %vm1955_vm0, %v1948_v51, %v3979_v60 }
 0x470   : > { %1957 = vst [vmem:[%s3203_s18] sm:$0xff] %v1956_v62  ;;  %1960 = vst [vmem:[#allocation3] sm:$0xff] %v1958_v5 }
 0x471   : > { %1962 = vst [vmem:[%s4017_s10] sm:$0xff] %v1958_v5 }
 0x472 PF: > { %s4065_s27 = sld [smem:[#allocation4_spill]] }
 0x478   : > { %s21_s13 = sadd.s32 1, %s4065_s27  }
 0x479   : > { %p18_p6 = scmp.ge.s32.totalorder %s21_s13, 4  }
 0x47b   :  { %20 = sbr.rel (!%p18_p6) target bundleno = 1 (0x1), region = 125 }

</bundles_post_ra>
